<compile_context>
chip_gen: v7x
topology: tpu7x:2x2x1
jax: 0.10.0
libtpu: 0.0.40
codegen_flags: <defaults>
</compile_context>

<pallas_src>
import jax
import jax.numpy as jnp
from jax.experimental import pallas as pl
from jax.experimental.pallas import tpu as pltpu


# ----------------------------------------------------------------------------
# Fused kernel: conv3x3 (im2col built in VMEM) + ReLU + avg-pool + FC head
# ----------------------------------------------------------------------------
def _make_fused_kernel(H, W, C_in, K, Kp):
    HW = H * W

    def kernel(x_ref, wc_ref, bc_ref, w1_ref, head_ref, w2_ref, b2_ref,
               out_ref, patch_ref):
        # x_ref    : (1, H+2, W+2, C_in) f32   padded NHWC image, this batch
        # wc_ref   : (Kp, C_feat)        bf16  conv weight, K=9*C_in zero-padded
        # bc_ref   : (1, C_feat)         f32
        # w1_ref   : (C_feat, n_hid)     f32
        # head_ref : (5, n_hid)          f32   rows = [b1, gamma, beta, mean, var]
        # w2_ref   : (n_hid, Np)         f32   feat_2 weight, zero-padded to 128
        # b2_ref   : (1, Np)             f32
        # out_ref  : (1, 1, Np)          f32
        # patch_ref: (HW, Kp)            f32   VMEM scratch (im2col patches)

        # Zero only the padded contraction lanes K..Kp (columns 0..K-1 are
        # fully overwritten below).  Re-done every grid step, so it is safe
        # under any megacore core assignment of the batch axis.
        patch_ref[:, K:] = jnp.zeros((HW, Kp - K), jnp.float32)

        # Build the im2col patch matrix in VMEM from the padded image
        # (no 9x-expanded patch matrix ever touches HBM).
        for t in range(9):
            dh, dw = divmod(t, 3)
            tap = x_ref[0, dh:dh + H, dw:dw + W, :]          # (H, W, C_in)
            patch_ref[:, t * C_in:(t + 1) * C_in] = tap.reshape(HW, C_in)

        # Conv stem as one lane-dense MXU matmul: bf16 operands, f32 accumulate.
        patches = patch_ref[...].astype(jnp.bfloat16)        # (HW, Kp)
        conv = jnp.dot(patches, wc_ref[...],
                       preferred_element_type=jnp.float32)   # (HW, C_feat) f32
        conv = jnp.maximum(conv + bc_ref[...], 0.0)          # f32 bias + ReLU

        # Fused AdaptiveAvgPool2d(1): mean over the spatial (sublane) axis.
        pooled = jnp.mean(conv, axis=0, keepdims=True)       # (1, C_feat)

        # feat_1 (dropout is identity in eval) + BatchNorm1d(eval) + ReLU.
        h = jnp.dot(pooled, w1_ref[...],
                    preferred_element_type=jnp.float32) + head_ref[0:1, :]
        h = (h - head_ref[3:4, :]) * jax.lax.rsqrt(head_ref[4:5, :] + 1e-5)
        h = h * head_ref[1:2, :] + head_ref[2:3, :]
        h = jnp.maximum(h, 0.0)

        # feat_2 (output lanes padded to Np=128 -> lane-dense unmasked store).
        y = jnp.dot(h, w2_ref[...],
                    preferred_element_type=jnp.float32) + b2_ref[...]   # (1, Np)
        out_ref[0] = y

    return kernel


# ----------------------------------------------------------------------------
# Wrapper
# ----------------------------------------------------------------------------
def hms2d_forward(x, params):
    """Forward pass of HMS2DModel (manifold_mixup=False, eval mode)."""
    (conv_w, conv_b, w1, b1, gamma, beta, rmean, rvar, w2, b2) = params
    B, C_in, H, W = x.shape
    C_feat = conv_w.shape[0]
    n_hid = w1.shape[1]
    n_cls = w2.shape[1]
    K = 9 * C_in
    Kp = ((K + 127) // 128) * 128          # pad contraction dim to 128 lanes
    Np = ((n_cls + 127) // 128) * 128      # pad output lanes to 128
    Hp, Wp = H + 2, W + 2
    HW = H * W

    # Single cheap layout pass: NCHW -> padded NHWC (channels on lanes).
    xp = jnp.pad(jnp.transpose(x, (0, 2, 3, 1)).astype(jnp.float32),
                 ((0, 0), (1, 1), (1, 1), (0, 0)))            # (B, Hp, Wp, C_in)

    # Conv weight in (tap*C_in, C_feat) layout matching the in-kernel patches,
    # zero-padded K -> Kp (padded rows are exactly zero), cast to bf16.
    wc = jnp.transpose(conv_w, (2, 3, 1, 0)).reshape(K, C_feat)
    wc = jnp.zeros((Kp, C_feat), jnp.float32).at[:K].set(wc).astype(jnp.bfloat16)
    bc = conv_b.reshape(1, C_feat).astype(jnp.float32)

    # Pack the five head vectors into one block -> one DMA.
    head_vec = jnp.stack([b1, gamma, beta, rmean, rvar], axis=0)  # (5, n_hid)

    # feat_2 padded to lane-dense width (padded columns are exactly zero).
    w2p = jnp.zeros((n_hid, Np), jnp.float32).at[:, :n_cls].set(w2)
    b2p = jnp.zeros((1, Np), jnp.float32).at[:, :n_cls].set(b2)

    kernel = _make_fused_kernel(H, W, C_in, K, Kp)

    out = pl.pallas_call(
        kernel,
        out_shape=jax.ShapeDtypeStruct((B, 1, Np), jnp.float32),
        grid_spec=pltpu.PrefetchScalarGridSpec(
            num_scalar_prefetch=0,
            grid=(B,),
            in_specs=[
                pl.BlockSpec((1, Hp, Wp, C_in), lambda b: (b, 0, 0, 0)),
                pl.BlockSpec((Kp, C_feat), lambda b: (0, 0)),
                pl.BlockSpec((1, C_feat), lambda b: (0, 0)),
                pl.BlockSpec((C_feat, n_hid), lambda b: (0, 0)),
                pl.BlockSpec((5, n_hid), lambda b: (0, 0)),
                pl.BlockSpec((n_hid, Np), lambda b: (0, 0)),
                pl.BlockSpec((1, Np), lambda b: (0, 0)),
            ],
            out_specs=pl.BlockSpec((1, 1, Np), lambda b: (b, 0, 0)),
            scratch_shapes=[pltpu.VMEM((HW, Kp), jnp.float32)],
        ),
        compiler_params=pltpu.CompilerParams(
            dimension_semantics=("parallel",)),
    )(xp, wc, bc, w1, head_vec, w2p, b2p)

    return out[:, 0, :n_cls]


def reference_forward(x, params):
    """Pure-JAX reference of the same forward semantics (f32 everywhere)."""
    (conv_w, conv_b, w1, b1, gamma, beta, rmean, rvar, w2, b2) = params
    y = jax.lax.conv_general_dilated(
        x, conv_w, window_strides=(1, 1), padding="SAME",
        dimension_numbers=("NCHW", "OIHW", "NCHW"))
    y = jnp.maximum(y + conv_b[None, :, None, None], 0.0)
    pooled = y.mean(axis=(2, 3))                              # AdaptiveAvgPool2d(1)
    h = pooled @ w1 + b1
    h = (h - rmean) / jnp.sqrt(rvar + 1e-5) * gamma + beta
    h = jnp.maximum(h, 0.0)
    return h @ w2 + b2


# ----------------------------------------------------------------------------
# Main
# ----------------------------------------------------------------------------
if __name__ == "__main__":
    # Small shapes consistent with the module: NCHW input, 2-class head.
    B, C_in, H, W = 2, 4, 16, 16
    C_feat = 128         # synthetic backbone feature width (lane-dense)
    n_hiddens = 32       # nn.LazyLinear(n_hiddens)
    n_classes = 2        # nn.LazyLinear(n_classes)

    key = jax.random.PRNGKey(0)
    ks = jax.random.split(key, 11)

    x = jax.random.normal(ks[0], (B, C_in, H, W), jnp.float32)

    conv_w = jax.random.normal(ks[1], (C_feat, C_in, 3, 3), jnp.float32) / jnp.sqrt(9 * C_in)
    conv_b = 0.1 * jax.random.normal(ks[2], (C_feat,), jnp.float32)
    w1 = jax.random.normal(ks[3], (C_feat, n_hiddens), jnp.float32) / jnp.sqrt(C_feat)
    b1 = 0.1 * jax.random.normal(ks[4], (n_hiddens,), jnp.float32)
    gamma = 1.0 + 0.1 * jax.random.normal(ks[5], (n_hiddens,), jnp.float32)
    beta = 0.1 * jax.random.normal(ks[6], (n_hiddens,), jnp.float32)
    rmean = 0.1 * jax.random.normal(ks[7], (n_hiddens,), jnp.float32)
    rvar = 1.0 + 0.5 * jax.random.uniform(ks[8], (n_hiddens,), jnp.float32)
    w2 = jax.random.normal(ks[9], (n_hiddens, n_classes), jnp.float32) / jnp.sqrt(n_hiddens)
    b2 = 0.1 * jax.random.normal(ks[10], (n_classes,), jnp.float32)

    params = (conv_w, conv_b, w1, b1, gamma, beta, rmean, rvar, w2, b2)

    out = hms2d_forward(x, params)
    out = jax.block_until_ready(out)

    ref = reference_forward(x, params)
    assert out.shape == (B, n_classes), out.shape
    assert jnp.allclose(out, ref, atol=2e-2, rtol=2e-2), (out, ref)

    print("KERNEL_OK")
</pallas_src>

<mosaic_0001>
module attributes {stable_mosaic.version = 11 : i64} {
  func.func @kernel(%arg0: i32, %arg1: memref<1x18x18x4xf32, #tpu.memory_space<vmem>>, %arg2: memref<128x128xbf16, #tpu.memory_space<vmem>>, %arg3: memref<1x128xf32, #tpu.memory_space<vmem>>, %arg4: memref<128x32xf32, #tpu.memory_space<vmem>>, %arg5: memref<5x32xf32, #tpu.memory_space<vmem>>, %arg6: memref<32x128xf32, #tpu.memory_space<vmem>>, %arg7: memref<1x128xf32, #tpu.memory_space<vmem>>, %arg8: memref<1x1x128xf32, #tpu.memory_space<vmem>>, %arg9: memref<256x128xf32, #tpu.memory_space<vmem>>) attributes {dimension_semantics = [#tpu.dimension_semantics<parallel>], iteration_bounds = array<i64: 2>, scalar_prefetch = 0 : i64, scratch_operands = 1 : i64, tpu.core_type = #tpu.core_type<tc>, window_params = [{transform_indices = @transform_0, window_bounds = array<i64: 1, 18, 18, 4>}, {pipeline_mode = #tpu.pipeline_mode<synchronous>, transform_indices = @transform_1, window_bounds = array<i64: 128, 128>}, {pipeline_mode = #tpu.pipeline_mode<synchronous>, transform_indices = @transform_2, window_bounds = array<i64: 1, 128>}, {pipeline_mode = #tpu.pipeline_mode<synchronous>, transform_indices = @transform_3, window_bounds = array<i64: 128, 32>}, {pipeline_mode = #tpu.pipeline_mode<synchronous>, transform_indices = @transform_4, window_bounds = array<i64: 5, 32>}, {pipeline_mode = #tpu.pipeline_mode<synchronous>, transform_indices = @transform_5, window_bounds = array<i64: 32, 128>}, {pipeline_mode = #tpu.pipeline_mode<synchronous>, transform_indices = @transform_6, window_bounds = array<i64: 1, 128>}, {transform_indices = @transform_7, window_bounds = array<i64: 1, 1, 128>}]} {
    %cst = arith.constant 0.000000e+00 : f32
    %0 = vector.broadcast %cst : f32 to vector<256x92xf32>
    %c0 = arith.constant 0 : index
    %c36 = arith.constant 36 : index
    %1 = vector.load %arg9[%c0, %c36] : memref<256x128xf32, #tpu.memory_space<vmem>>, vector<256x92xf32>
    tpu.vector_store %arg9[%c0, %c36], %0 {strides = array<i32>} : memref<256x128xf32, #tpu.memory_space<vmem>>, vector<256x92xf32>,
    %c0_0 = arith.constant 0 : index
    %c0_1 = arith.constant 0 : index
    %c0_2 = arith.constant 0 : index
    %c0_3 = arith.constant 0 : index
    %2 = vector.load %arg1[%c0_0, %c0_1, %c0_2, %c0_3] : memref<1x18x18x4xf32, #tpu.memory_space<vmem>>, vector<1x16x16x4xf32>
    %3 = vector.shape_cast %2 : vector<1x16x16x4xf32> to vector<16x16x4xf32>
    %4 = vector.shape_cast %3 : vector<16x16x4xf32> to vector<256x4xf32>
    %c0_4 = arith.constant 0 : index
    %c0_5 = arith.constant 0 : index
    %5 = vector.load %arg9[%c0_4, %c0_5] : memref<256x128xf32, #tpu.memory_space<vmem>>, vector<256x4xf32>
    tpu.vector_store %arg9[%c0_4, %c0_5], %4 {strides = array<i32>} : memref<256x128xf32, #tpu.memory_space<vmem>>, vector<256x4xf32>,
    %c0_6 = arith.constant 0 : index
    %c0_7 = arith.constant 0 : index
    %c1 = arith.constant 1 : index
    %c0_8 = arith.constant 0 : index
    %6 = vector.load %arg1[%c0_6, %c0_7, %c1, %c0_8] : memref<1x18x18x4xf32, #tpu.memory_space<vmem>>, vector<1x16x16x4xf32>
    %7 = vector.shape_cast %6 : vector<1x16x16x4xf32> to vector<16x16x4xf32>
    %8 = vector.shape_cast %7 : vector<16x16x4xf32> to vector<256x4xf32>
    %c0_9 = arith.constant 0 : index
    %c4 = arith.constant 4 : index
    %9 = vector.load %arg9[%c0_9, %c4] : memref<256x128xf32, #tpu.memory_space<vmem>>, vector<256x4xf32>
    tpu.vector_store %arg9[%c0_9, %c4], %8 {strides = array<i32>} : memref<256x128xf32, #tpu.memory_space<vmem>>, vector<256x4xf32>,
    %c0_10 = arith.constant 0 : index
    %c0_11 = arith.constant 0 : index
    %c2 = arith.constant 2 : index
    %c0_12 = arith.constant 0 : index
    %10 = vector.load %arg1[%c0_10, %c0_11, %c2, %c0_12] : memref<1x18x18x4xf32, #tpu.memory_space<vmem>>, vector<1x16x16x4xf32>
    %11 = vector.shape_cast %10 : vector<1x16x16x4xf32> to vector<16x16x4xf32>
    %12 = vector.shape_cast %11 : vector<16x16x4xf32> to vector<256x4xf32>
    %c0_13 = arith.constant 0 : index
    %c8 = arith.constant 8 : index
    %13 = vector.load %arg9[%c0_13, %c8] : memref<256x128xf32, #tpu.memory_space<vmem>>, vector<256x4xf32>
    tpu.vector_store %arg9[%c0_13, %c8], %12 {strides = array<i32>} : memref<256x128xf32, #tpu.memory_space<vmem>>, vector<256x4xf32>,
    %c0_14 = arith.constant 0 : index
    %c1_15 = arith.constant 1 : index
    %c0_16 = arith.constant 0 : index
    %c0_17 = arith.constant 0 : index
    %14 = vector.load %arg1[%c0_14, %c1_15, %c0_16, %c0_17] : memref<1x18x18x4xf32, #tpu.memory_space<vmem>>, vector<1x16x16x4xf32>
    %15 = vector.shape_cast %14 : vector<1x16x16x4xf32> to vector<16x16x4xf32>
    %16 = vector.shape_cast %15 : vector<16x16x4xf32> to vector<256x4xf32>
    %c0_18 = arith.constant 0 : index
    %c12 = arith.constant 12 : index
    %17 = vector.load %arg9[%c0_18, %c12] : memref<256x128xf32, #tpu.memory_space<vmem>>, vector<256x4xf32>
    tpu.vector_store %arg9[%c0_18, %c12], %16 {strides = array<i32>} : memref<256x128xf32, #tpu.memory_space<vmem>>, vector<256x4xf32>,
    %c0_19 = arith.constant 0 : index
    %c1_20 = arith.constant 1 : index
    %c1_21 = arith.constant 1 : index
    %c0_22 = arith.constant 0 : index
    %18 = vector.load %arg1[%c0_19, %c1_20, %c1_21, %c0_22] : memref<1x18x18x4xf32, #tpu.memory_space<vmem>>, vector<1x16x16x4xf32>
    %19 = vector.shape_cast %18 : vector<1x16x16x4xf32> to vector<16x16x4xf32>
    %20 = vector.shape_cast %19 : vector<16x16x4xf32> to vector<256x4xf32>
    %c0_23 = arith.constant 0 : index
    %c16 = arith.constant 16 : index
    %21 = vector.load %arg9[%c0_23, %c16] : memref<256x128xf32, #tpu.memory_space<vmem>>, vector<256x4xf32>
    tpu.vector_store %arg9[%c0_23, %c16], %20 {strides = array<i32>} : memref<256x128xf32, #tpu.memory_space<vmem>>, vector<256x4xf32>,
    %c0_24 = arith.constant 0 : index
    %c1_25 = arith.constant 1 : index
    %c2_26 = arith.constant 2 : index
    %c0_27 = arith.constant 0 : index
    %22 = vector.load %arg1[%c0_24, %c1_25, %c2_26, %c0_27] : memref<1x18x18x4xf32, #tpu.memory_space<vmem>>, vector<1x16x16x4xf32>
    %23 = vector.shape_cast %22 : vector<1x16x16x4xf32> to vector<16x16x4xf32>
    %24 = vector.shape_cast %23 : vector<16x16x4xf32> to vector<256x4xf32>
    %c0_28 = arith.constant 0 : index
    %c20 = arith.constant 20 : index
    %25 = vector.load %arg9[%c0_28, %c20] : memref<256x128xf32, #tpu.memory_space<vmem>>, vector<256x4xf32>
    tpu.vector_store %arg9[%c0_28, %c20], %24 {strides = array<i32>} : memref<256x128xf32, #tpu.memory_space<vmem>>, vector<256x4xf32>,
    %c0_29 = arith.constant 0 : index
    %c2_30 = arith.constant 2 : index
    %c0_31 = arith.constant 0 : index
    %c0_32 = arith.constant 0 : index
    %26 = vector.load %arg1[%c0_29, %c2_30, %c0_31, %c0_32] : memref<1x18x18x4xf32, #tpu.memory_space<vmem>>, vector<1x16x16x4xf32>
    %27 = vector.shape_cast %26 : vector<1x16x16x4xf32> to vector<16x16x4xf32>
    %28 = vector.shape_cast %27 : vector<16x16x4xf32> to vector<256x4xf32>
    %c0_33 = arith.constant 0 : index
    %c24 = arith.constant 24 : index
    %29 = vector.load %arg9[%c0_33, %c24] : memref<256x128xf32, #tpu.memory_space<vmem>>, vector<256x4xf32>
    tpu.vector_store %arg9[%c0_33, %c24], %28 {strides = array<i32>} : memref<256x128xf32, #tpu.memory_space<vmem>>, vector<256x4xf32>,
    %c0_34 = arith.constant 0 : index
    %c2_35 = arith.constant 2 : index
    %c1_36 = arith.constant 1 : index
    %c0_37 = arith.constant 0 : index
    %30 = vector.load %arg1[%c0_34, %c2_35, %c1_36, %c0_37] : memref<1x18x18x4xf32, #tpu.memory_space<vmem>>, vector<1x16x16x4xf32>
    %31 = vector.shape_cast %30 : vector<1x16x16x4xf32> to vector<16x16x4xf32>
    %32 = vector.shape_cast %31 : vector<16x16x4xf32> to vector<256x4xf32>
    %c0_38 = arith.constant 0 : index
    %c28 = arith.constant 28 : index
    %33 = vector.load %arg9[%c0_38, %c28] : memref<256x128xf32, #tpu.memory_space<vmem>>, vector<256x4xf32>
    tpu.vector_store %arg9[%c0_38, %c28], %32 {strides = array<i32>} : memref<256x128xf32, #tpu.memory_space<vmem>>, vector<256x4xf32>,
    %c0_39 = arith.constant 0 : index
    %c2_40 = arith.constant 2 : index
    %c2_41 = arith.constant 2 : index
    %c0_42 = arith.constant 0 : index
    %34 = vector.load %arg1[%c0_39, %c2_40, %c2_41, %c0_42] : memref<1x18x18x4xf32, #tpu.memory_space<vmem>>, vector<1x16x16x4xf32>
    %35 = vector.shape_cast %34 : vector<1x16x16x4xf32> to vector<16x16x4xf32>
    %36 = vector.shape_cast %35 : vector<16x16x4xf32> to vector<256x4xf32>
    %c0_43 = arith.constant 0 : index
    %c32 = arith.constant 32 : index
    %37 = vector.load %arg9[%c0_43, %c32] : memref<256x128xf32, #tpu.memory_space<vmem>>, vector<256x4xf32>
    tpu.vector_store %arg9[%c0_43, %c32], %36 {strides = array<i32>} : memref<256x128xf32, #tpu.memory_space<vmem>>, vector<256x4xf32>,
    %c0_44 = arith.constant 0 : index
    %c0_45 = arith.constant 0 : index
    %38 = vector.load %arg9[%c0_44, %c0_45] : memref<256x128xf32, #tpu.memory_space<vmem>>, vector<256x128xf32>
    %39 = arith.truncf %38 : vector<256x128xf32> to vector<256x128xbf16>
    %c0_46 = arith.constant 0 : index
    %c0_47 = arith.constant 0 : index
    %40 = vector.load %arg2[%c0_46, %c0_47] : memref<128x128xbf16, #tpu.memory_space<vmem>>, vector<128x128xbf16>
    %cst_48 = arith.constant dense<0.000000e+00> : vector<256x128xf32>
    %41 = tpu.matmul %39, %40, %cst_48 {dimension_numbers = #tpu.dot_dimension_numbers<[1], [0], [0], [1], [0, 0, 1, 1], [], []>} : vector<256x128xbf16>, vector<128x128xbf16>, vector<256x128xf32> -> vector<256x128xf32>
    %c0_49 = arith.constant 0 : index
    %c0_50 = arith.constant 0 : index
    %42 = vector.load %arg3[%c0_49, %c0_50] : memref<1x128xf32, #tpu.memory_space<vmem>>, vector<1x128xf32>
    %43 = vector.broadcast %42 : vector<1x128xf32> to vector<256x128xf32>
    %44 = arith.addf %41, %43 : vector<256x128xf32>
    %cst_51 = arith.constant 0.000000e+00 : f32
    %45 = vector.broadcast %cst_51 : f32 to vector<256x128xf32>
    %46 = arith.maximumf %44, %45 : vector<256x128xf32>
    %cst_52 = arith.constant dense<0.000000e+00> : vector<128xf32>
    %47 = vector.multi_reduction <add>, %46, %cst_52 [0] : vector<256x128xf32> to vector<128xf32>
    %48 = vector.shape_cast %47 : vector<128xf32> to vector<1x128xf32>
    %cst_53 = arith.constant 2.560000e+02 : f32
    %49 = vector.broadcast %cst_53 : f32 to vector<1x128xf32>
    %50 = arith.divf %48, %49 : vector<1x128xf32>
    %c0_54 = arith.constant 0 : index
    %c0_55 = arith.constant 0 : index
    %51 = vector.load %arg4[%c0_54, %c0_55] : memref<128x32xf32, #tpu.memory_space<vmem>>, vector<128x32xf32>
    %cst_56 = arith.constant dense<0.000000e+00> : vector<1x32xf32>
    %52 = tpu.matmul %50, %51, %cst_56 {dimension_numbers = #tpu.dot_dimension_numbers<[1], [0], [0], [1], [0, 0, 1, 1], [], []>} : vector<1x128xf32>, vector<128x32xf32>, vector<1x32xf32> -> vector<1x32xf32>
    %c0_57 = arith.constant 0 : index
    %c0_58 = arith.constant 0 : index
    %53 = vector.load %arg5[%c0_57, %c0_58] : memref<5x32xf32, #tpu.memory_space<vmem>>, vector<1x32xf32>
    %54 = arith.addf %52, %53 : vector<1x32xf32>
    %c3 = arith.constant 3 : index
    %c0_59 = arith.constant 0 : index
    %55 = vector.load %arg5[%c3, %c0_59] : memref<5x32xf32, #tpu.memory_space<vmem>>, vector<1x32xf32>
    %56 = arith.subf %54, %55 : vector<1x32xf32>
    %c4_60 = arith.constant 4 : index
    %c0_61 = arith.constant 0 : index
    %57 = vector.load %arg5[%c4_60, %c0_61] : memref<5x32xf32, #tpu.memory_space<vmem>>, vector<1x32xf32>
    %cst_62 = arith.constant 9.99999974E-6 : f32
    %58 = vector.broadcast %cst_62 : f32 to vector<1x32xf32>
    %59 = arith.addf %57, %58 : vector<1x32xf32>
    %60 = math.rsqrt %59 : vector<1x32xf32>
    %61 = arith.mulf %56, %60 : vector<1x32xf32>
    %c1_63 = arith.constant 1 : index
    %c0_64 = arith.constant 0 : index
    %62 = vector.load %arg5[%c1_63, %c0_64] : memref<5x32xf32, #tpu.memory_space<vmem>>, vector<1x32xf32>
    %63 = arith.mulf %61, %62 : vector<1x32xf32>
    %c2_65 = arith.constant 2 : index
    %c0_66 = arith.constant 0 : index
    %64 = vector.load %arg5[%c2_65, %c0_66] : memref<5x32xf32, #tpu.memory_space<vmem>>, vector<1x32xf32>
    %65 = arith.addf %63, %64 : vector<1x32xf32>
    %cst_67 = arith.constant 0.000000e+00 : f32
    %66 = vector.broadcast %cst_67 : f32 to vector<1x32xf32>
    %67 = arith.maximumf %65, %66 : vector<1x32xf32>
    %c0_68 = arith.constant 0 : index
    %c0_69 = arith.constant 0 : index
    %68 = vector.load %arg6[%c0_68, %c0_69] : memref<32x128xf32, #tpu.memory_space<vmem>>, vector<32x128xf32>
    %cst_70 = arith.constant dense<0.000000e+00> : vector<1x128xf32>
    %69 = tpu.matmul %67, %68, %cst_70 {dimension_numbers = #tpu.dot_dimension_numbers<[1], [0], [0], [1], [0, 0, 1, 1], [], []>} : vector<1x32xf32>, vector<32x128xf32>, vector<1x128xf32> -> vector<1x128xf32>
    %c0_71 = arith.constant 0 : index
    %c0_72 = arith.constant 0 : index
    %70 = vector.load %arg7[%c0_71, %c0_72] : memref<1x128xf32, #tpu.memory_space<vmem>>, vector<1x128xf32>
    %71 = arith.addf %69, %70 : vector<1x128xf32>
    %c0_73 = arith.constant 0 : index
    %c0_74 = arith.constant 0 : index
    %c0_75 = arith.constant 0 : index
    %72 = vector.load %arg8[%c0_73, %c0_74, %c0_75] : memref<1x1x128xf32, #tpu.memory_space<vmem>>, vector<1x1x128xf32>
    %73 = vector.shape_cast %72 : vector<1x1x128xf32> to vector<1x128xf32>
    %74 = vector.shape_cast %71 : vector<1x128xf32> to vector<1x1x128xf32>
    tpu.vector_store %arg8[%c0_73, %c0_74, %c0_75], %74 {strides = array<i32>} : memref<1x1x128xf32, #tpu.memory_space<vmem>>, vector<1x1x128xf32>,
    return
  }
  func.func @transform_0(%arg0: i32) -> (i32, i32, i32, i32) {
    %c0_i32 = arith.constant 0 : i32
    %c0_i32_0 = arith.constant 0 : i32
    %c0_i32_1 = arith.constant 0 : i32
    %c0_i32_2 = arith.constant 0 : i32
    return %arg0, %c0_i32, %c0_i32_0, %c0_i32_1 : i32, i32, i32, i32
  }
  func.func @transform_1(%arg0: i32) -> (i32, i32) {
    %c0_i32 = arith.constant 0 : i32
    %c0_i32_0 = arith.constant 0 : i32
    %c0_i32_1 = arith.constant 0 : i32
    return %c0_i32, %c0_i32_0 : i32, i32
  }
  func.func @transform_2(%arg0: i32) -> (i32, i32) {
    %c0_i32 = arith.constant 0 : i32
    %c0_i32_0 = arith.constant 0 : i32
    %c0_i32_1 = arith.constant 0 : i32
    return %c0_i32, %c0_i32_0 : i32, i32
  }
  func.func @transform_3(%arg0: i32) -> (i32, i32) {
    %c0_i32 = arith.constant 0 : i32
    %c0_i32_0 = arith.constant 0 : i32
    %c0_i32_1 = arith.constant 0 : i32
    return %c0_i32, %c0_i32_0 : i32, i32
  }
  func.func @transform_4(%arg0: i32) -> (i32, i32) {
    %c0_i32 = arith.constant 0 : i32
    %c0_i32_0 = arith.constant 0 : i32
    %c0_i32_1 = arith.constant 0 : i32
    return %c0_i32, %c0_i32_0 : i32, i32
  }
  func.func @transform_5(%arg0: i32) -> (i32, i32) {
    %c0_i32 = arith.constant 0 : i32
    %c0_i32_0 = arith.constant 0 : i32
    %c0_i32_1 = arith.constant 0 : i32
    return %c0_i32, %c0_i32_0 : i32, i32
  }
  func.func @transform_6(%arg0: i32) -> (i32, i32) {
    %c0_i32 = arith.constant 0 : i32
    %c0_i32_0 = arith.constant 0 : i32
    %c0_i32_1 = arith.constant 0 : i32
    return %c0_i32, %c0_i32_0 : i32, i32
  }
  func.func @transform_7(%arg0: i32) -> (i32, i32, i32) {
    %c0_i32 = arith.constant 0 : i32
    %c0_i32_0 = arith.constant 0 : i32
    %c0_i32_1 = arith.constant 0 : i32
    return %arg0, %c0_i32, %c0_i32_0 : i32, i32, i32
  }
}

</mosaic_0001>

<bundles_post_ra>
// kernel: tpu_custom_call.1
= control target key start
LH: loop header
LB: loop body
LE: loop exit
PB: predicated region body
PF: predicated region fallthrough
CT: control target
= control target key end

     0   :  { %12 = vsyncpa [#allocation4], 0  ;;  %s4387_s0 = inlined_call_operand.vmem [shape: f32[2,18,18,4], index: 0, kind: input, shape index: {}]   ;;  %s4388_s1 = inlined_call_operand.vmem [shape: bf16[128,128], index: 1, kind: input, shape index: {}]   ;;  %s4389_s2 = inlined_call_operand.vmem [shape: f32[1,128], index: 2, kind: input, shape index: {}]   ;;  %s4390_s3 = inlined_call_operand.vmem [shape: f32[128,32], index: 3, kind: input, shape index: {}]   ;;  %s4391_s4 = inlined_call_operand.vmem [shape: f32[5,32], index: 4, kind: input, shape index: {}]   ;;  %s4392_s5 = inlined_call_operand.vmem [shape: f32[32,128], index: 5, kind: input, shape index: {}]   ;;  %s4393_s6 = inlined_call_operand.vmem [shape: f32[1,128], index: 6, kind: input, shape index: {}]   ;;  %s4394_s7 = inlined_call_operand.hbm [shape: f32[2,1,128], index: 7, kind: output, shape index: {}]  }
   0x1   :  { %14 = vsyncpa [#allocation4 + $0x1], 0  ;;  %s3075_s24 = smov 0   ;;  %s3077_s25 = smov 0  }
   0x2   :  { %s3079_s26 = smov 0   ;;  %s3081_s27 = smov 0  }
   0x3 LB: > { %s3096_s28 = sadd.s32 4294967295, %s3021_s27   ;;  %s2518_s29 = sadd.s32 4294967294, %s3021_s27   ;;  %s3021_s27 = sphi %s3081_s27, %s4400_s27   ;;  %s3017_s26 = sphi %s3079_s26, %s4399_s26   ;;  %s3013_s25 = sphi %s3077_s25, %s4398_s25   ;;  %s3009_s24 = sphi %s3075_s24, %s4397_s24  }
   0x4   : > { %s3100_s30 = sadd.s32 1, %s3021_s27   ;;  %s179_s8 = sadd.s32 1, %s3017_s26 }
   0x5   : > { %s176_s9 = ssub.s32 %s3021_s27, %s3100_s30  ;;  %p189_p0 = scmp.ne.s32.totalorder %s3017_s26, %s3013_s25 }
   0x6   : > { %p177_p1 = scmp.eq.s32.totalorder %s176_s9, 0  ;;  %p190_p2 = scmp.eq.s32.totalorder %s3096_s28, 1 }
   0x7   : > { %p195_p3 = scmp.ne.s32.totalorder %s3013_s25, %s3009_s24  ;;  %p196_p4 = scmp.eq.s32.totalorder %s2518_s29, 1 }
   0x8   : > { %s3111_s10 = scalar_select %p177_p1, %s3017_s26, %s179_s8  }
   0x9   : > { %p3113_p5 = por %p190_p2, %p189_p0  ;;  %p3117_p6 = por %p196_p4, %p195_p3 }
   0xa   : > { %p2521_p7 = scmp.ge.s32.totalorder %s3021_s27, 1  ;;  %p240_p8 = scmp.lt.s32.totalorder %s3021_s27, 3 }
   0xc   : > { %p241_p9 = pnand %p2521_p7, %p240_p8 }
   0xd   : > { %p271_p10 = scmp.lt.s32.totalorder (!%p241_p9), %s3096_s28, 1  ;;  %vm277_vm0 = vcmask (!%p241_p9), 1047840   ;;  %v3023_v0 = vmov (!%p241_p9), 0.0   ;;  %s3024_s18 = smov (!%p241_p9), 4   ;;  %vm342_vm1 = vcmask (!%p241_p9), 31744   ;;  %v2949_v25 = vld [vmem:[%s4388_s1] sm:$0xff] (!%p241_p9)  }
   0xe   : > { %244 = sbr.rel (%p241_p9) target bundleno = 1351 (0x547), region = 48  ;;  %280 = vst.msk [vmem:[#allocation2 + $0x10] sm:$0xff] (!%p241_p9), %vm277_vm0, %v3023_v0  ;;  %278 = vst.msk [vmem:[#allocation2] sm:$0xff] (!%p241_p9), %vm277_vm0, %v3023_v0  ;;  %s3025_s19 = smov (!%p241_p9), 8   ;;  %2774 = vmatprep.subr.bf16.mxu0 (!%p241_p9), %v2949_v25  ;;  %v2950_v26 = vld [vmem:[%s4388_s1 + $0x8] sm:$0xff] (!%p241_p9)   ;;  %v2951_v29 = vld [vmem:[%s4388_s1 + $0x10] sm:$0xff] (!%p241_p9)  }
   0xf   : > { %279 = vst.msk [vmem:[#allocation2 + $0x8] sm:$0xff] (!%p241_p9), %vm277_vm0, %v3023_v0  ;;  %281 = vst.msk [vmem:[#allocation2 + $0x18] sm:$0xff] (!%p241_p9), %vm277_vm0, %v3023_v0  ;;  %s3026_s20 = smov (!%p241_p9), 12   ;;  %s3027_s21 = smov (!%p241_p9), 16   ;;  %2775 = vmatpush3.bf16.msra.mxu0 (!%p241_p9), %v2949_v25  ;;  %v2952_v30 = vld [vmem:[%s4388_s1 + $0x18] sm:$0xff] (!%p241_p9)   ;;  %v2953_v33 = vld [vmem:[%s4388_s1 + $0x20] sm:$0xff] (!%p241_p9)  }
  0x10   : > { %282 = vst.msk [vmem:[#allocation2 + $0x20] sm:$0xff] (!%p241_p9), %vm277_vm0, %v3023_v0  ;;  %283 = vst.msk [vmem:[#allocation2 + $0x28] sm:$0xff] (!%p241_p9), %vm277_vm0, %v3023_v0  ;;  %s3028_s9 = smov (!%p241_p9), 20   ;;  %2776 = vmatprep.subr.bf16.mxu0 (!%p241_p9), %v2950_v26  ;;  %s3029_s22 = smov (!%p241_p9), 24   ;;  %v2954_v34 = vld [vmem:[%s4388_s1 + $0x28] sm:$0xff] (!%p241_p9)   ;;  %v2955_v37 = vld [vmem:[%s4388_s1 + $0x30] sm:$0xff] (!%p241_p9)  }
  0x11   : > { %284 = vst.msk [vmem:[#allocation2 + $0x30] sm:$0xff] (!%p241_p9), %vm277_vm0, %v3023_v0  ;;  %285 = vst.msk [vmem:[#allocation2 + $0x38] sm:$0xff] (!%p241_p9), %vm277_vm0, %v3023_v0  ;;  %v2956_v38 = vld [vmem:[%s4388_s1 + $0x38] sm:$0xff] (!%p241_p9)   ;;  %s3031_s8 = smov (!%p241_p9), 32   ;;  %vm535_vm2 = vcmask (!%p241_p9), 64544   ;;  %vm728_vm3 = vcmask (!%p241_p9), 97344  }
  0x12   : > { %286 = vst.msk [vmem:[#allocation2 + $0x40] sm:$0xff] (!%p241_p9), %vm277_vm0, %v3023_v0  ;;  %287 = vst.msk [vmem:[#allocation2 + $0x48] sm:$0xff] (!%p241_p9), %vm277_vm0, %v3023_v0  ;;  %vm922_vm4 = vcmask (!%p241_p9), 130144   ;;  %vm1115_vm5 = vcmask (!%p241_p9), 162944   ;;  %vm1308_vm6 = vcmask (!%p241_p9), 195744   ;;  %vm1502_vm7 = vcmask (!%p241_p9), 228544  }
  0x13   : > { %288 = vst.msk [vmem:[#allocation2 + $0x50] sm:$0xff] (!%p241_p9), %vm277_vm0, %v3023_v0  ;;  %289 = vst.msk [vmem:[#allocation2 + $0x58] sm:$0xff] (!%p241_p9), %vm277_vm0, %v3023_v0  ;;  %2777 = vmatpush3.bf16.msra.mxu0 (!%p241_p9), %v2950_v26  ;;  %vm1695_vm8 = vcmask (!%p241_p9), 261344   ;;  %vm1888_vm9 = vcmask (!%p241_p9), 294144   ;;  %vm3033_vm10 = vmmov (!%p241_p9), 0   ;;  %vm2375_vm11 = vcmask (!%p241_p9), 261120  }
  0x14   : > { %290 = vst.msk [vmem:[#allocation2 + $0x60] sm:$0xff] (!%p241_p9), %vm277_vm0, %v3023_v0  ;;  %291 = vst.msk [vmem:[#allocation2 + $0x68] sm:$0xff] (!%p241_p9), %vm277_vm0, %v3023_v0  ;;  %2778 = vmatprep.subr.bf16.mxu0 (!%p241_p9), %v2951_v29  ;;  %2854 = vmatprep.mubr.msk.f32.mxu1 (!%p241_p9), %vm3033_vm10, %v3023_v0  ;;  %s269_s16 = sand.u32 (!%p241_p9), 1, %s3013_s25  }
  0x15   : > { %292 = vst.msk [vmem:[#allocation2 + $0x70] sm:$0xff] %vm277_vm0, %v3023_v0  ;;  %293 = vst.msk [vmem:[#allocation2 + $0x78] sm:$0xff] %vm277_vm0, %v3023_v0  ;;  %s272_s13 = scalar_select %p271_p10, %s3096_s28, 1 }
  0x16   : > { %294 = vst.msk [vmem:[#allocation2 + $0x80] sm:$0xff] %vm277_vm0, %v3023_v0  ;;  %295 = vst.msk [vmem:[#allocation2 + $0x88] sm:$0xff] %vm277_vm0, %v3023_v0 }
  0x17   : > { %296 = vst.msk [vmem:[#allocation2 + $0x90] sm:$0xff] %vm277_vm0, %v3023_v0  ;;  %297 = vst.msk [vmem:[#allocation2 + $0x98] sm:$0xff] %vm277_vm0, %v3023_v0  ;;  %s2898_s14 = smul.u32 432, %s272_s13  ;;  %2779 = vmatpush3.bf16.msra.mxu0 %v2951_v29  ;;  %s270_s13 = scalar_lea.vmem [#allocation3], %s269_s16 }
  0x18   : > { %298 = vst.msk [vmem:[#allocation2 + $0xa0] sm:$0xff] %vm277_vm0, %v3023_v0  ;;  %299 = vst.msk [vmem:[#allocation2 + $0xa8] sm:$0xff] %vm277_vm0, %v3023_v0  ;;  %2780 = vmatprep.subr.bf16.mxu0 %v2952_v30  ;;  %s2463_s15 = sshll.u32 %s270_s13, 4  ;;  %s4347_s15 = int_to_ptr.vmem [resolvable:$true] %s2463_s15 }
  0x19   : > { %300 = vst.msk [vmem:[#allocation2 + $0xb0] sm:$0xff] %vm277_vm0, %v3023_v0  ;;  %301 = vst.msk [vmem:[#allocation2 + $0xb8] sm:$0xff] %vm277_vm0, %v3023_v0  ;;  %s3194_s17 = scalar_lea.vmem %s4387_s0, %s2898_s14  ;;  %s3030_s14 = smov 28  }
  0x1a   : > { %302 = vst.msk [vmem:[#allocation2 + $0xc0] sm:$0xff] %vm277_vm0, %v3023_v0  ;;  %303 = vst.msk [vmem:[#allocation2 + $0xc8] sm:$0xff] %vm277_vm0, %v3023_v0  ;;  %v377_v1 = vld [vmem:[%s3194_s17 + $0x19] sm:$0xff]  ;;  %v375_v2 = vld [vmem:[%s3194_s17 + $0x1] sm:$0xff] }
  0x1b   : > { %304 = vst.msk [vmem:[#allocation2 + $0xd0] sm:$0xff] %vm277_vm0, %v3023_v0  ;;  %305 = vst.msk [vmem:[#allocation2 + $0xd8] sm:$0xff] %vm277_vm0, %v3023_v0  ;;  %443 = vrot.lane.b32.xlu1 %v377_v1, %s3024_s18  ;;  %439 = vrot.lane.b32.xlu0 %v375_v2, %s3024_s18  ;;  %v378_v3 = vld [vmem:[%s3194_s17 + $0x21] sm:$0xff]  ;;  %v376_v4 = vld [vmem:[%s3194_s17 + $0x9] sm:$0xff] }
  0x1c   : > { %306 = vst.msk [vmem:[#allocation2 + $0xe0] sm:$0xff] %vm277_vm0, %v3023_v0  ;;  %307 = vst.msk [vmem:[#allocation2 + $0xe8] sm:$0xff] %vm277_vm0, %v3023_v0  ;;  %v2524_v5 = vld [vmem:[%s3194_s17 + $0x20] sm:$0xff]  ;;  %v2523_v6 = vld [vmem:[%s3194_s17 + $0x18] sm:$0xff]  ;;  %2781 = vmatpush3.bf16.msra.mxu0 %v2952_v30 }
  0x1d   : > { %308 = vst.msk [vmem:[#allocation2 + $0xf0] sm:$0xff] %vm277_vm0, %v3023_v0  ;;  %309 = vst.msk [vmem:[#allocation2 + $0xf8] sm:$0xff] %vm277_vm0, %v3023_v0  ;;  %v3205_v7 = vld [vmem:[%s3194_s17 + $0x38] sm:$0xff]  ;;  %v3208_v8 = vld [vmem:[%s3194_s17 + $0x30] sm:$0xff]  ;;  %2782 = vmatprep.subr.bf16.mxu0 %v2953_v33 }
  0x1e   : > { %345 = vst.msk [vmem:[#allocation2 + $0x10] sm:$0xff] %vm342_vm1, %v2523_v6  ;;  %346 = vst.msk [vmem:[#allocation2 + $0x18] sm:$0xff] %vm342_vm1, %v2524_v5  ;;  %v569_v9 = vld [vmem:[%s3194_s17 + $0xa] sm:$0xff]  ;;  %v568_v10 = vld [vmem:[%s3194_s17 + $0x2] sm:$0xff] }
  0x1f   : > { %348 = vst.msk [vmem:[#allocation2 + $0x28] sm:$0xff] %vm342_vm1, %v3205_v7  ;;  %445 = vrot.lane.b32.xlu1 %v378_v3, %s3024_s18  ;;  %441 = vrot.lane.b32.xlu0 %v376_v4, %s3024_s18  ;;  %347 = vst.msk [vmem:[#allocation2 + $0x20] sm:$0xff] %vm342_vm1, %v3208_v8  ;;  %v3221_v11 = vld [vmem:[%s3194_s17 + $0x50] sm:$0xff]  ;;  %v3224_v12 = vld [vmem:[%s3194_s17 + $0x48] sm:$0xff] }
  0x20   : > { %350 = vst.msk [vmem:[#allocation2 + $0x38] sm:$0xff] %vm342_vm1, %v3221_v11  ;;  %349 = vst.msk [vmem:[#allocation2 + $0x30] sm:$0xff] %vm342_vm1, %v3224_v12  ;;  %v3231_v13 = vld [vmem:[%s3194_s17 + $0x68] sm:$0xff]  ;;  %v3234_v14 = vld [vmem:[%s3194_s17 + $0x60] sm:$0xff]  ;;  %2783 = vmatpush3.bf16.msra.mxu0 %v2953_v33 }
  0x21   : > { %v571_v15 = vld [vmem:[%s3194_s17 + $0x22] sm:$0xff]  ;;  %352 = vst.msk [vmem:[#allocation2 + $0x48] sm:$0xff] %vm342_vm1, %v3231_v13  ;;  %351 = vst.msk [vmem:[#allocation2 + $0x40] sm:$0xff] %vm342_vm1, %v3234_v14  ;;  %v570_v16 = vld [vmem:[%s3194_s17 + $0x1a] sm:$0xff]  ;;  %2784 = vmatprep.subr.bf16.mxu0 %v2954_v34 }
  0x22   : > { %v3245_v17 = vld [vmem:[%s3194_s17 + $0x80] sm:$0xff]  ;;  %v3248_v18 = vld [vmem:[%s3194_s17 + $0x78] sm:$0xff]  ;;  %v311_v20 = vld [vmem:[%s3194_s17 + $0x8] sm:$0xff] }
  0x23   : > { %634 = vrot.lane.b32.xlu1 %v569_v9, %s3025_s19  ;;  %632 = vrot.lane.b32.xlu0 %v568_v10, %s3025_s19  ;;  %v310_v19 = vld [vmem:[%s3194_s17] sm:$0xff]  ;;  %354 = vst.msk [vmem:[#allocation2 + $0x58] sm:$0xff] %vm342_vm1, %v3245_v17  ;;  %353 = vst.msk [vmem:[#allocation2 + $0x50] sm:$0xff] %vm342_vm1, %v3248_v18  ;;  %v3263_v21 = vld [vmem:[%s3194_s17 + $0x98] sm:$0xff] }
  0x24   : > { %343 = vst.msk [vmem:[#allocation2] sm:$0xff] %vm342_vm1, %v310_v19  ;;  %344 = vst.msk [vmem:[#allocation2 + $0x8] sm:$0xff] %vm342_vm1, %v311_v20  ;;  %v3266_v22 = vld [vmem:[%s3194_s17 + $0x90] sm:$0xff]  ;;  %v2558_v23 = vld [vmem:[%s3194_s17 + $0x39] sm:$0xff]  ;;  %2785 = vmatpush3.bf16.msra.mxu0 %v2954_v34 }
  0x25   : > { %356 = vst.msk [vmem:[#allocation2 + $0x68] sm:$0xff] %vm342_vm1, %v3263_v21  ;;  %355 = vst.msk [vmem:[#allocation2 + $0x60] sm:$0xff] %vm342_vm1, %v3266_v22  ;;  %v2557_v24 = vld [vmem:[%s3194_s17 + $0x31] sm:$0xff]  ;;  %v2590_v27 = vld [vmem:[%s3194_s17 + $0x3a] sm:$0xff]  ;;  %2786 = vmatprep.subr.bf16.mxu0 %v2955_v37 }
  0x26   : > { %v2589_v28 = vld [vmem:[%s3194_s17 + $0x32] sm:$0xff]  ;;  %v3308_v32 = vld [vmem:[%s3194_s17 + $0xa8] sm:$0xff]  ;;  %v3358_v42 = vld [vmem:[%s3194_s17 + $0xc0] sm:$0xff] }
  0x27   : > { %638 = vrot.lane.b32.xlu1 %v571_v15, %s3025_s19  ;;  %636 = vrot.lane.b32.xlu0 %v570_v16, %s3025_s19  ;;  %v3305_v31 = vld [vmem:[%s3194_s17 + $0xb0] sm:$0xff]  ;;  %357 = vst.msk [vmem:[#allocation2 + $0x70] sm:$0xff] %vm342_vm1, %v3308_v32  ;;  %v3355_v41 = vld [vmem:[%s3194_s17 + $0xc8] sm:$0xff]  ;;  %359 = vst.msk [vmem:[#allocation2 + $0x80] sm:$0xff] %vm342_vm1, %v3358_v42 }
  0x28   : > { %358 = vst.msk [vmem:[#allocation2 + $0x78] sm:$0xff] %vm342_vm1, %v3305_v31  ;;  %v2654_v35 = vld [vmem:[%s3194_s17 + $0x51] sm:$0xff]  ;;  %v2653_v36 = vld [vmem:[%s3194_s17 + $0x49] sm:$0xff]  ;;  %2787 = vmatpush3.bf16.msra.mxu0 %v2955_v37  ;;  %360 = vst.msk [vmem:[#allocation2 + $0x88] sm:$0xff] %vm342_vm1, %v3355_v41 }
  0x29   : > { %2788 = vmatprep.subr.bf16.mxu0 %v2956_v38  ;;  %v2686_v39 = vld [vmem:[%s3194_s17 + $0x52] sm:$0xff]  ;;  %v2685_v40 = vld [vmem:[%s3194_s17 + $0x4a] sm:$0xff]  ;;  %v2561_v44 = vld [vmem:[%s3194_s17 + $0x61] sm:$0xff] }
  0x2a   : > { %v2562_v43 = vld [vmem:[%s3194_s17 + $0x69] sm:$0xff]  ;;  %v3385_v47 = vld [vmem:[%s3194_s17 + $0xe0] sm:$0xff]  ;;  %v3388_v48 = vld [vmem:[%s3194_s17 + $0xd8] sm:$0xff] }
  0x2b   : > { %828 = vrot.lane.b32.xlu1 %v2524_v5, %s3026_s20  ;;  %826 = vrot.lane.b32.xlu0 %v2523_v6, %s3026_s20  ;;  %v2594_v45 = vld [vmem:[%s3194_s17 + $0x6a] sm:$0xff]  ;;  %v2593_v46 = vld [vmem:[%s3194_s17 + $0x62] sm:$0xff]  ;;  %362 = vst.msk [vmem:[#allocation2 + $0x98] sm:$0xff] %vm342_vm1, %v3385_v47  ;;  %361 = vst.msk [vmem:[#allocation2 + $0x90] sm:$0xff] %vm342_vm1, %v3388_v48 }
  0x2c   : > { %2789 = vmatpush3.bf16.msra.mxu0 %v2956_v38  ;;  %v3401_v49 = vld [vmem:[%s3194_s17 + $0x81] sm:$0xff]  ;;  %v3404_v50 = vld [vmem:[%s3194_s17 + $0x79] sm:$0xff]  ;;  %v3460_v9 = vld [vmem:[%s3194_s17 + $0xf0] sm:$0xff] }
  0x2d   : > { %v3421_v57 = vld [vmem:[%s3194_s17 + $0x82] sm:$0xff]  ;;  %v3424_v58 = vld [vmem:[%s3194_s17 + $0x7a] sm:$0xff]  ;;  %363 = vst.msk [vmem:[#allocation2 + $0xa0] sm:$0xff] %vm342_vm1, %v3460_v9  ;;  %v3498_v19 = vld [vmem:[%s3194_s17 + $0x92] sm:$0xff] }
  0x2e   : > { %v3518_v29 = vld [vmem:[%s3194_s17 + $0x108] sm:$0xff]  ;;  %v3535_v30 = vld [vmem:[%s3194_s17 + $0xb1] sm:$0xff] }
  0x2f   : > { %832 = vrot.lane.b32.xlu1 %v3205_v7, %s3026_s20  ;;  %830 = vrot.lane.b32.xlu0 %v3208_v8, %s3026_s20  ;;  %365 = vst.msk [vmem:[#allocation2 + $0xb0] sm:$0xff] %vm342_vm1, %v3518_v29  ;;  %v3538_v33 = vld [vmem:[%s3194_s17 + $0xa9] sm:$0xff] }
  0x33   : > { %1021 = vrot.lane.b32.xlu1 %v378_v3, %s3027_s21  ;;  %1019 = vrot.lane.b32.xlu0 %v377_v1, %s3027_s21 }
  0x37   : > { %1025 = vrot.lane.b32.xlu1 %v2558_v23, %s3027_s21  ;;  %1023 = vrot.lane.b32.xlu0 %v2557_v24, %s3027_s21 }
  0x3b   : > { %1214 = vrot.lane.b32.xlu1 %v571_v15, %s3028_s9  ;;  %1212 = vrot.lane.b32.xlu0 %v570_v16, %s3028_s9 }
  0x3f   : > { %1218 = vrot.lane.b32.xlu1 %v2590_v27, %s3028_s9  ;;  %1216 = vrot.lane.b32.xlu0 %v2589_v28, %s3028_s9 }
  0x43   : > { %1408 = vrot.lane.b32.xlu1 %v3205_v7, %s3029_s22  ;;  %1406 = vrot.lane.b32.xlu0 %v3208_v8, %s3029_s22  ;;  %v3457_v8 = vld [vmem:[%s3194_s17 + $0xf8] sm:$0xff] }
  0x44   : > { %364 = vst.msk [vmem:[#allocation2 + $0xa8] sm:$0xff] %vm342_vm1, %v3457_v8 }
  0x47   : > { %1412 = vrot.lane.b32.xlu1 %v3221_v11, %s3029_s22  ;;  %1410 = vrot.lane.b32.xlu0 %v3224_v12, %s3029_s22 }
  0x4b   : > { %1601 = vrot.lane.b32.xlu1 %v2558_v23, %s3030_s14  ;;  %1599 = vrot.lane.b32.xlu0 %v2557_v24, %s3030_s14 }
  0x4f   : > { %1605 = vrot.lane.b32.xlu1 %v2654_v35, %s3030_s14  ;;  %1603 = vrot.lane.b32.xlu0 %v2653_v36, %s3030_s14 }
  0x53   : > { %1794 = vrot.lane.b32.xlu1 %v2590_v27, %s3031_s8  ;;  %1792 = vrot.lane.b32.xlu0 %v2589_v28, %s3031_s8 }
  0x57   : > { %449 = vrot.lane.b32.xlu1 %v2558_v23, %s3024_s18  ;;  %447 = vrot.lane.b32.xlu0 %v2557_v24, %s3024_s18 }
  0x5b   : > { %1798 = vrot.lane.b32.xlu1 %v2686_v39, %s3031_s8  ;;  %1796 = vrot.lane.b32.xlu0 %v2685_v40, %s3031_s8 }
  0x5f   : > { %453 = vrot.lane.b32.xlu1 %v2654_v35, %s3024_s18  ;;  %451 = vrot.lane.b32.xlu0 %v2653_v36, %s3024_s18 }
  0x63   : > { %642 = vrot.lane.b32.xlu1 %v2590_v27, %s3025_s19  ;;  %640 = vrot.lane.b32.xlu0 %v2589_v28, %s3025_s19  ;;  %v3515_v28 = vld [vmem:[%s3194_s17 + $0x110] sm:$0xff] }
  0x64   : > { %366 = vst.msk [vmem:[#allocation2 + $0xb8] sm:$0xff] %vm342_vm1, %v3515_v28 }
  0x67   : > { %646 = vrot.lane.b32.xlu1 %v2686_v39, %s3025_s19  ;;  %644 = vrot.lane.b32.xlu0 %v2685_v40, %s3025_s19 }
  0x6b   : > { %836 = vrot.lane.b32.xlu1 %v3221_v11, %s3026_s20  ;;  %834 = vrot.lane.b32.xlu0 %v3224_v12, %s3026_s20  ;;  %v3477_v12 = vld [vmem:[%s3194_s17 + $0x99] sm:$0xff] }
  0x6f   : > { %840 = vrot.lane.b32.xlu1 %v3231_v13, %s3026_s20  ;;  %838 = vrot.lane.b32.xlu0 %v3234_v14, %s3026_s20 }
  0x73   : > { %1029 = vrot.lane.b32.xlu1 %v2654_v35, %s3027_s21  ;;  %1027 = vrot.lane.b32.xlu0 %v2653_v36, %s3027_s21 }
  0x77   : > { %1033 = vrot.lane.b32.xlu1 %v2562_v43, %s3027_s21  ;;  %1031 = vrot.lane.b32.xlu0 %v2561_v44, %s3027_s21 }
  0x7b   : > { %1222 = vrot.lane.b32.xlu1 %v2686_v39, %s3028_s9  ;;  %1220 = vrot.lane.b32.xlu0 %v2685_v40, %s3028_s9 }
  0x7f   : > { %1226 = vrot.lane.b32.xlu1 %v2594_v45, %s3028_s9  ;;  %1224 = vrot.lane.b32.xlu0 %v2593_v46, %s3028_s9 }
  0x83   : > { %1416 = vrot.lane.b32.xlu1 %v3231_v13, %s3029_s22  ;;  %1414 = vrot.lane.b32.xlu0 %v3234_v14, %s3029_s22  ;;  %v3480_v13 = vld [vmem:[%s3194_s17 + $0x91] sm:$0xff] }
  0x87   : > { %1420 = vrot.lane.b32.xlu1 %v3245_v17, %s3029_s22  ;;  %1418 = vrot.lane.b32.xlu0 %v3248_v18, %s3029_s22 }
  0x8b   : > { %1609 = vrot.lane.b32.xlu1 %v2562_v43, %s3030_s14  ;;  %1607 = vrot.lane.b32.xlu0 %v2561_v44, %s3030_s14 }
  0x8d   : > { %v444_v51 = vpop.permute.xlu1 %443  ;;  %v440_v52 = vpop.permute.xlu0 %439 }
  0x8e   : > { %538 = vst.msk [vmem:[#allocation2 + $0x10] sm:$0xff] %vm535_vm2, %v444_v51  ;;  %536 = vst.msk [vmem:[#allocation2] sm:$0xff] %vm535_vm2, %v440_v52  ;;  %v2693_v51 = vld [vmem:[%s3194_s17 + $0xaa] sm:$0xff] }
  0x8f   : > { %1613 = vrot.lane.b32.xlu1 %v3401_v49, %s3030_s14  ;;  %1611 = vrot.lane.b32.xlu0 %v3404_v50, %s3030_s14 }
  0x91   : > { %v446_v53 = vpop.permute.xlu1 %445  ;;  %v442_v54 = vpop.permute.xlu0 %441 }
  0x92   : > { %539 = vst.msk [vmem:[#allocation2 + $0x18] sm:$0xff] %vm535_vm2, %v446_v53  ;;  %537 = vst.msk [vmem:[#allocation2 + $0x8] sm:$0xff] %vm535_vm2, %v442_v54 }
  0x93   : > { %1802 = vrot.lane.b32.xlu1 %v2594_v45, %s3031_s8  ;;  %1800 = vrot.lane.b32.xlu0 %v2593_v46, %s3031_s8 }
  0x95   : > { %v635_v55 = vpop.permute.xlu1 %634  ;;  %v633_v56 = vpop.permute.xlu0 %632 }
  0x96   : > { %730 = vst.msk [vmem:[#allocation2 + $0x8] sm:$0xff] %vm728_vm3, %v635_v55  ;;  %729 = vst.msk [vmem:[#allocation2] sm:$0xff] %vm728_vm3, %v633_v56 }
  0x97   : > { %457 = vrot.lane.b32.xlu1 %v2562_v43, %s3024_s18  ;;  %455 = vrot.lane.b32.xlu0 %v2561_v44, %s3024_s18 }
  0x99   : > { %v639_v59 = vpop.permute.xlu1 %638  ;;  %v637_v60 = vpop.permute.xlu0 %636 }
  0x9a   : > { %732 = vst.msk [vmem:[#allocation2 + $0x18] sm:$0xff] %vm728_vm3, %v639_v59  ;;  %731 = vst.msk [vmem:[#allocation2 + $0x10] sm:$0xff] %vm728_vm3, %v637_v60 }
  0x9b   : > { %1806 = vrot.lane.b32.xlu1 %v3421_v57, %s3031_s8  ;;  %1804 = vrot.lane.b32.xlu0 %v3424_v58, %s3031_s8 }
  0x9d   : > { %v829_v61 = vpop.permute.xlu1 %828  ;;  %v827_v62 = vpop.permute.xlu0 %826 }
  0x9e   : > { %924 = vst.msk [vmem:[#allocation2 + $0x8] sm:$0xff] %vm922_vm4, %v829_v61  ;;  %923 = vst.msk [vmem:[#allocation2] sm:$0xff] %vm922_vm4, %v827_v62 }
  0x9f   : > { %461 = vrot.lane.b32.xlu1 %v3401_v49, %s3024_s18  ;;  %459 = vrot.lane.b32.xlu0 %v3404_v50, %s3024_s18 }
  0xa1   : > { %v833_v63 = vpop.permute.xlu1 %832  ;;  %v831_v1 = vpop.permute.xlu0 %830 }
  0xa2   : > { %926 = vst.msk [vmem:[#allocation2 + $0x18] sm:$0xff] %vm922_vm4, %v833_v63  ;;  %925 = vst.msk [vmem:[#allocation2 + $0x10] sm:$0xff] %vm922_vm4, %v831_v1  ;;  %v3589_v1 = vld [vmem:[%s3194_s17 + $0x128] sm:$0xff] }
  0xa3   : > { %650 = vrot.lane.b32.xlu1 %v2594_v45, %s3025_s19  ;;  %648 = vrot.lane.b32.xlu0 %v2593_v46, %s3025_s19  ;;  %368 = vst.msk [vmem:[#allocation2 + $0xc8] sm:$0xff] %vm342_vm1, %v3589_v1 }
  0xa5   : > { %v1022_v2 = vpop.permute.xlu1 %1021  ;;  %v1020_v3 = vpop.permute.xlu0 %1019 }
  0xa6   : > { %1117 = vst.msk [vmem:[#allocation2 + $0x8] sm:$0xff] %vm1115_vm5, %v1022_v2  ;;  %1116 = vst.msk [vmem:[#allocation2] sm:$0xff] %vm1115_vm5, %v1020_v3  ;;  %v3592_v2 = vld [vmem:[%s3194_s17 + $0x120] sm:$0xff]  ;;  %v3609_v3 = vld [vmem:[%s3194_s17 + $0xc9] sm:$0xff] }
  0xa7   : > { %654 = vrot.lane.b32.xlu1 %v3421_v57, %s3025_s19  ;;  %652 = vrot.lane.b32.xlu0 %v3424_v58, %s3025_s19  ;;  %367 = vst.msk [vmem:[#allocation2 + $0xc0] sm:$0xff] %vm342_vm1, %v3592_v2 }
  0xa9   : > { %v1026_v4 = vpop.permute.xlu1 %1025  ;;  %v1024_v5 = vpop.permute.xlu0 %1023 }
  0xaa   : > { %1119 = vst.msk [vmem:[#allocation2 + $0x18] sm:$0xff] %vm1115_vm5, %v1026_v4  ;;  %1118 = vst.msk [vmem:[#allocation2 + $0x10] sm:$0xff] %vm1115_vm5, %v1024_v5  ;;  %v3612_v4 = vld [vmem:[%s3194_s17 + $0xc1] sm:$0xff] }
  0xab   : > { %844 = vrot.lane.b32.xlu1 %v3245_v17, %s3026_s20  ;;  %842 = vrot.lane.b32.xlu0 %v3248_v18, %s3026_s20  ;;  %v3495_v18 = vld [vmem:[%s3194_s17 + $0x9a] sm:$0xff] }
  0xad   : > { %v1215_v6 = vpop.permute.xlu1 %1214  ;;  %v1213_v7 = vpop.permute.xlu0 %1212 }
  0xae   : > { %1310 = vst.msk [vmem:[#allocation2 + $0x8] sm:$0xff] %vm1308_vm6, %v1215_v6  ;;  %1309 = vst.msk [vmem:[#allocation2] sm:$0xff] %vm1308_vm6, %v1213_v7 }
  0xaf   : > { %848 = vrot.lane.b32.xlu1 %v3263_v21, %s3026_s20  ;;  %846 = vrot.lane.b32.xlu0 %v3266_v22, %s3026_s20 }
  0xb1   : > { %v1219_v10 = vpop.permute.xlu1 %1218  ;;  %v1217_v11 = vpop.permute.xlu0 %1216 }
  0xb2   : > { %1312 = vst.msk [vmem:[#allocation2 + $0x18] sm:$0xff] %vm1308_vm6, %v1219_v10  ;;  %1311 = vst.msk [vmem:[#allocation2 + $0x10] sm:$0xff] %vm1308_vm6, %v1217_v11  ;;  %v3625_v11 = vld [vmem:[%s3194_s17 + $0xca] sm:$0xff] }
  0xb3   : > { %1037 = vrot.lane.b32.xlu1 %v3401_v49, %s3027_s21  ;;  %1035 = vrot.lane.b32.xlu0 %v3404_v50, %s3027_s21  ;;  %v2694_v50 = vld [vmem:[%s3194_s17 + $0xb2] sm:$0xff] }
  0xb5   : > { %v1409_v14 = vpop.permute.xlu1 %1408  ;;  %v1407_v15 = vpop.permute.xlu0 %1406 }
  0xb6   : > { %1504 = vst.msk [vmem:[#allocation2 + $0x8] sm:$0xff] %vm1502_vm7, %v1409_v14  ;;  %1503 = vst.msk [vmem:[#allocation2] sm:$0xff] %vm1502_vm7, %v1407_v15 }
  0xb7   : > { %1041 = vrot.lane.b32.xlu1 %v3477_v12, %s3027_s21  ;;  %1039 = vrot.lane.b32.xlu0 %v3480_v13, %s3027_s21 }
  0xb9   : > { %v1413_v16 = vpop.permute.xlu1 %1412  ;;  %v1411_v17 = vpop.permute.xlu0 %1410 }
  0xba   : > { %1506 = vst.msk [vmem:[#allocation2 + $0x18] sm:$0xff] %vm1502_vm7, %v1413_v16  ;;  %1505 = vst.msk [vmem:[#allocation2 + $0x10] sm:$0xff] %vm1502_vm7, %v1411_v17 }
  0xbb   : > { %1230 = vrot.lane.b32.xlu1 %v3421_v57, %s3028_s9  ;;  %1228 = vrot.lane.b32.xlu0 %v3424_v58, %s3028_s9 }
  0xbd   : > { %v1602_v20 = vpop.permute.xlu1 %1601  ;;  %v1600_v23 = vpop.permute.xlu0 %1599 }
  0xbe   : > { %1697 = vst.msk [vmem:[#allocation2 + $0x8] sm:$0xff] %vm1695_vm8, %v1602_v20  ;;  %1696 = vst.msk [vmem:[#allocation2] sm:$0xff] %vm1695_vm8, %v1600_v23  ;;  %v3648_v20 = vld [vmem:[%s3194_s17 + $0x138] sm:$0xff]  ;;  %v3665_v23 = vld [vmem:[%s3194_s17 + $0xe1] sm:$0xff] }
  0xbf   : > { %1234 = vrot.lane.b32.xlu1 %v3495_v18, %s3028_s9  ;;  %1232 = vrot.lane.b32.xlu0 %v3498_v19, %s3028_s9  ;;  %369 = vst.msk [vmem:[#allocation2 + $0xd0] sm:$0xff] %vm342_vm1, %v3648_v20 }
  0xc1   : > { %v1606_v24 = vpop.permute.xlu1 %1605  ;;  %v1604_v25 = vpop.permute.xlu0 %1603 }
  0xc2   : > { %1699 = vst.msk [vmem:[#allocation2 + $0x18] sm:$0xff] %vm1695_vm8, %v1606_v24  ;;  %1698 = vst.msk [vmem:[#allocation2 + $0x10] sm:$0xff] %vm1695_vm8, %v1604_v25  ;;  %v3668_v24 = vld [vmem:[%s3194_s17 + $0xd9] sm:$0xff] }
  0xc3   : > { %1424 = vrot.lane.b32.xlu1 %v3263_v21, %s3029_s22  ;;  %1422 = vrot.lane.b32.xlu0 %v3266_v22, %s3029_s22 }
  0xc5   : > { %v1795_v26 = vpop.permute.xlu1 %1794  ;;  %v1793_v27 = vpop.permute.xlu0 %1792 }
  0xc6   : > { %1890 = vst.msk [vmem:[#allocation2 + $0x8] sm:$0xff] %vm1888_vm9, %v1795_v26  ;;  %1889 = vst.msk [vmem:[#allocation2] sm:$0xff] %vm1888_vm9, %v1793_v27 }
  0xc7   : > { %1428 = vrot.lane.b32.xlu1 %v3305_v31, %s3029_s22  ;;  %1426 = vrot.lane.b32.xlu0 %v3308_v32, %s3029_s22 }
  0xc9   : > { %v450_v21 = vpop.permute.xlu1 %449  ;;  %v448_v22 = vpop.permute.xlu0 %447 }
  0xca   : > { %541 = vst.msk [vmem:[#allocation2 + $0x28] sm:$0xff] %vm535_vm2, %v450_v21  ;;  %540 = vst.msk [vmem:[#allocation2 + $0x20] sm:$0xff] %vm535_vm2, %v448_v22 }
  0xcb   : > { %1617 = vrot.lane.b32.xlu1 %v3477_v12, %s3030_s14  ;;  %1615 = vrot.lane.b32.xlu0 %v3480_v13, %s3030_s14 }
  0xcd   : > { %v1799_v34 = vpop.permute.xlu1 %1798  ;;  %v1797_v35 = vpop.permute.xlu0 %1796  ;;  %v1921_v36 = vld [vmem:[#allocation2] sm:$0xff]  ;;  %v1922_v37 = vld [vmem:[#allocation2 + $0x8] sm:$0xff] }
  0xce   : > { %1892 = vst.msk [vmem:[#allocation2 + $0x18] sm:$0xff] %vm1888_vm9, %v1799_v34  ;;  %1891 = vst.msk [vmem:[#allocation2 + $0x10] sm:$0xff] %vm1888_vm9, %v1797_v35  ;;  %v1953_v38 = vpack.c.bf16 %v1922_v37, %v1921_v36 }
  0xcf   : > { %1621 = vrot.lane.b32.xlu1 %v3535_v30, %s3030_s14  ;;  %1619 = vrot.lane.b32.xlu0 %v3538_v33, %s3030_s14 }
  0xd0   : > { %2790 = vmatprep.mubr.bf16.mxu0 %v1953_v38 }
  0xd1   : > { %v454_v39 = vpop.permute.xlu1 %453  ;;  %v452_v40 = vpop.permute.xlu0 %451 }
  0xd2   : > { %543 = vst.msk [vmem:[#allocation2 + $0x38] sm:$0xff] %vm535_vm2, %v454_v39  ;;  %542 = vst.msk [vmem:[#allocation2 + $0x30] sm:$0xff] %vm535_vm2, %v452_v40  ;;  %v2698_v39 = vld [vmem:[%s3194_s17 + $0xe2] sm:$0xff]  ;;  %v2697_v40 = vld [vmem:[%s3194_s17 + $0xda] sm:$0xff] }
  0xd3   : > { %1810 = vrot.lane.b32.xlu1 %v3495_v18, %s3031_s8  ;;  %1808 = vrot.lane.b32.xlu0 %v3498_v19, %s3031_s8 }
  0xd5   : > { %v643_v43 = vpop.permute.xlu1 %642  ;;  %v641_v44 = vpop.permute.xlu0 %640  ;;  %v1923_v45 = vld [vmem:[#allocation2 + $0x10] sm:$0xff]  ;;  %v1924_v46 = vld [vmem:[#allocation2 + $0x18] sm:$0xff] }
  0xd6   : > { %734 = vst.msk [vmem:[#allocation2 + $0x28] sm:$0xff] %vm728_vm3, %v643_v43  ;;  %733 = vst.msk [vmem:[#allocation2 + $0x20] sm:$0xff] %vm728_vm3, %v641_v44  ;;  %v1954_v49 = vpack.c.bf16 %v1924_v46, %v1923_v45 }
  0xd7   : > { %465 = vrot.lane.b32.xlu1 %v3477_v12, %s3024_s18  ;;  %463 = vrot.lane.b32.xlu0 %v3480_v13, %s3024_s18  ;;  %v3628_v12 = vld [vmem:[%s3194_s17 + $0xc2] sm:$0xff] }
  0xd8   : > { %2791 = vmatmul.mubr.bf16.vlgmr.msra.gmra.mrb[0].mxu0 %v1954_v49 }
  0xd9   : > { %v647_v52 = vpop.permute.xlu1 %646  ;;  %v645_v53 = vpop.permute.xlu0 %644 }
  0xda   : > { %736 = vst.msk [vmem:[#allocation2 + $0x38] sm:$0xff] %vm728_vm3, %v647_v52  ;;  %735 = vst.msk [vmem:[#allocation2 + $0x30] sm:$0xff] %vm728_vm3, %v645_v53 }
  0xdb   : > { %1814 = vrot.lane.b32.xlu1 %v2694_v50, %s3031_s8  ;;  %1812 = vrot.lane.b32.xlu0 %v2693_v51, %s3031_s8 }
  0xdd   : > { %v837_v54 = vpop.permute.xlu1 %836  ;;  %v835_v55 = vpop.permute.xlu0 %834 }
  0xde   : > { %928 = vst.msk [vmem:[#allocation2 + $0x28] sm:$0xff] %vm922_vm4, %v837_v54  ;;  %927 = vst.msk [vmem:[#allocation2 + $0x20] sm:$0xff] %vm922_vm4, %v835_v55 }
  0xdf   : > { %469 = vrot.lane.b32.xlu1 %v3535_v30, %s3024_s18  ;;  %467 = vrot.lane.b32.xlu0 %v3538_v33, %s3024_s18 }
  0xe1   : > { %v841_v56 = vpop.permute.xlu1 %840  ;;  %v839_v57 = vpop.permute.xlu0 %838 }
  0xe2   : > { %930 = vst.msk [vmem:[#allocation2 + $0x38] sm:$0xff] %vm922_vm4, %v841_v56  ;;  %929 = vst.msk [vmem:[#allocation2 + $0x30] sm:$0xff] %vm922_vm4, %v839_v57  ;;  %v3723_v57 = vld [vmem:[%s3194_s17 + $0x158] sm:$0xff] }
  0xe3   : > { %658 = vrot.lane.b32.xlu1 %v3495_v18, %s3025_s19  ;;  %656 = vrot.lane.b32.xlu0 %v3498_v19, %s3025_s19  ;;  %v3645_v19 = vld [vmem:[%s3194_s17 + $0x140] sm:$0xff]  ;;  %372 = vst.msk [vmem:[#allocation2 + $0xe8] sm:$0xff] %vm342_vm1, %v3723_v57 }
  0xe4   : > { %370 = vst.msk [vmem:[#allocation2 + $0xd8] sm:$0xff] %vm342_vm1, %v3645_v19 }
  0xe5   : > { %v1030_v58 = vpop.permute.xlu1 %1029  ;;  %v1028_v59 = vpop.permute.xlu0 %1027 }
  0xe6   : > { %1121 = vst.msk [vmem:[#allocation2 + $0x28] sm:$0xff] %vm1115_vm5, %v1030_v58  ;;  %1120 = vst.msk [vmem:[#allocation2 + $0x20] sm:$0xff] %vm1115_vm5, %v1028_v59  ;;  %v3739_v59 = vld [vmem:[%s3194_s17 + $0xf9] sm:$0xff] }
  0xe7   : > { %662 = vrot.lane.b32.xlu1 %v2694_v50, %s3025_s19  ;;  %660 = vrot.lane.b32.xlu0 %v2693_v51, %s3025_s19 }
  0xe9   : > { %v1034_v60 = vpop.permute.xlu1 %1033  ;;  %v1032_v61 = vpop.permute.xlu0 %1031 }
  0xea   : > { %1123 = vst.msk [vmem:[#allocation2 + $0x38] sm:$0xff] %vm1115_vm5, %v1034_v60  ;;  %1122 = vst.msk [vmem:[#allocation2 + $0x30] sm:$0xff] %vm1115_vm5, %v1032_v61  ;;  %v3742_v60 = vld [vmem:[%s3194_s17 + $0xf1] sm:$0xff] }
  0xeb   : > { %852 = vrot.lane.b32.xlu1 %v3305_v31, %s3026_s20  ;;  %850 = vrot.lane.b32.xlu0 %v3308_v32, %s3026_s20 }
  0xed   : > { %v1223_v62 = vpop.permute.xlu1 %1222  ;;  %v1221_v63 = vpop.permute.xlu0 %1220 }
  0xee   : > { %1314 = vst.msk [vmem:[#allocation2 + $0x28] sm:$0xff] %vm1308_vm6, %v1223_v62  ;;  %1313 = vst.msk [vmem:[#allocation2 + $0x20] sm:$0xff] %vm1308_vm6, %v1221_v63 }
  0xef   : > { %856 = vrot.lane.b32.xlu1 %v3355_v41, %s3026_s20  ;;  %854 = vrot.lane.b32.xlu0 %v3358_v42, %s3026_s20 }
  0xf1   : > { %v1227_v31 = vpop.permute.xlu1 %1226  ;;  %v1225_v32 = vpop.permute.xlu0 %1224 }
  0xf2   : > { %1316 = vst.msk [vmem:[#allocation2 + $0x38] sm:$0xff] %vm1308_vm6, %v1227_v31  ;;  %1315 = vst.msk [vmem:[#allocation2 + $0x30] sm:$0xff] %vm1308_vm6, %v1225_v32  ;;  %v3755_v32 = vld [vmem:[%s3194_s17 + $0xfa] sm:$0xff] }
  0xf3   : > { %1045 = vrot.lane.b32.xlu1 %v3535_v30, %s3027_s21  ;;  %1043 = vrot.lane.b32.xlu0 %v3538_v33, %s3027_s21 }
  0xf5   : > { %v1417_v5 = vpop.permute.xlu1 %1416  ;;  %v1415_v6 = vpop.permute.xlu0 %1414 }
  0xf6   : > { %1508 = vst.msk [vmem:[#allocation2 + $0x28] sm:$0xff] %vm1502_vm7, %v1417_v5  ;;  %1507 = vst.msk [vmem:[#allocation2 + $0x20] sm:$0xff] %vm1502_vm7, %v1415_v6 }
  0xf7   : > { %1049 = vrot.lane.b32.xlu1 %v3609_v3, %s3027_s21  ;;  %1047 = vrot.lane.b32.xlu0 %v3612_v4, %s3027_s21 }
  0xf9   : > { %v1421_v7 = vpop.permute.xlu1 %1420  ;;  %v1419_v10 = vpop.permute.xlu0 %1418 }
  0xfa   : > { %1510 = vst.msk [vmem:[#allocation2 + $0x38] sm:$0xff] %vm1502_vm7, %v1421_v7  ;;  %1509 = vst.msk [vmem:[#allocation2 + $0x30] sm:$0xff] %vm1502_vm7, %v1419_v10 }
  0xfb   : > { %1238 = vrot.lane.b32.xlu1 %v2694_v50, %s3028_s9  ;;  %1236 = vrot.lane.b32.xlu0 %v2693_v51, %s3028_s9 }
  0xfd   : > { %v1610_v13 = vpop.permute.xlu1 %1609  ;;  %v1608_v14 = vpop.permute.xlu0 %1607 }
  0xfe   : > { %1701 = vst.msk [vmem:[#allocation2 + $0x28] sm:$0xff] %vm1695_vm8, %v1610_v13  ;;  %1700 = vst.msk [vmem:[#allocation2 + $0x20] sm:$0xff] %vm1695_vm8, %v1608_v14  ;;  %v3795_v14 = vld [vmem:[%s3194_s17 + $0x111] sm:$0xff] }
  0xff   : > { %1242 = vrot.lane.b32.xlu1 %v3625_v11, %s3028_s9  ;;  %1240 = vrot.lane.b32.xlu0 %v3628_v12, %s3028_s9 }
 0x101   : > { %v1614_v15 = vpop.permute.xlu1 %1613  ;;  %v1612_v16 = vpop.permute.xlu0 %1611 }
 0x102   : > { %1703 = vst.msk [vmem:[#allocation2 + $0x38] sm:$0xff] %vm1695_vm8, %v1614_v15  ;;  %1702 = vst.msk [vmem:[#allocation2 + $0x30] sm:$0xff] %vm1695_vm8, %v1612_v16  ;;  %v3798_v15 = vld [vmem:[%s3194_s17 + $0x109] sm:$0xff] }
 0x103   : > { %1432 = vrot.lane.b32.xlu1 %v3355_v41, %s3029_s22  ;;  %1430 = vrot.lane.b32.xlu0 %v3358_v42, %s3029_s22 }
 0x105   : > { %v1803_v17 = vpop.permute.xlu1 %1802  ;;  %v1801_v18 = vpop.permute.xlu0 %1800 }
 0x106   : > { %1894 = vst.msk [vmem:[#allocation2 + $0x28] sm:$0xff] %vm1888_vm9, %v1803_v17  ;;  %1893 = vst.msk [vmem:[#allocation2 + $0x20] sm:$0xff] %vm1888_vm9, %v1801_v18 }
 0x107   : > { %1436 = vrot.lane.b32.xlu1 %v3385_v47, %s3029_s22  ;;  %1434 = vrot.lane.b32.xlu0 %v3388_v48, %s3029_s22 }
 0x109   : > { %v458_v41 = vpop.permute.xlu1 %457  ;;  %v456_v42 = vpop.permute.xlu0 %455 }
 0x10a   : > { %545 = vst.msk [vmem:[#allocation2 + $0x48] sm:$0xff] %vm535_vm2, %v458_v41  ;;  %544 = vst.msk [vmem:[#allocation2 + $0x40] sm:$0xff] %vm535_vm2, %v456_v42 }
 0x10b   : > { %1625 = vrot.lane.b32.xlu1 %v3609_v3, %s3030_s14  ;;  %1623 = vrot.lane.b32.xlu0 %v3612_v4, %s3030_s14 }
 0x10d   : > { %v1807_v25 = vpop.permute.xlu1 %1806  ;;  %v1805_v26 = vpop.permute.xlu0 %1804  ;;  %v1925_v27 = vld [vmem:[#allocation2 + $0x20] sm:$0xff]  ;;  %v1926_v21 = vld [vmem:[#allocation2 + $0x28] sm:$0xff] }
 0x10e   : > { %1896 = vst.msk [vmem:[#allocation2 + $0x38] sm:$0xff] %vm1888_vm9, %v1807_v25  ;;  %1895 = vst.msk [vmem:[#allocation2 + $0x30] sm:$0xff] %vm1888_vm9, %v1805_v26  ;;  %v1955_v22 = vpack.c.bf16 %v1926_v21, %v1925_v27 }
 0x10f   : > { %1629 = vrot.lane.b32.xlu1 %v3665_v23, %s3030_s14  ;;  %1627 = vrot.lane.b32.xlu0 %v3668_v24, %s3030_s14 }
 0x110   : > { %2794 = vmatprep.mubr.bf16.mxu0 %v1955_v22 }
 0x111   : > { %v462_v30 = vpop.permute.xlu1 %461  ;;  %v460_v33 = vpop.permute.xlu0 %459 }
 0x112   : > { %547 = vst.msk [vmem:[#allocation2 + $0x58] sm:$0xff] %vm535_vm2, %v462_v30  ;;  %546 = vst.msk [vmem:[#allocation2 + $0x50] sm:$0xff] %vm535_vm2, %v460_v33  ;;  %v2702_v30 = vld [vmem:[%s3194_s17 + $0x112] sm:$0xff]  ;;  %v2701_v33 = vld [vmem:[%s3194_s17 + $0x10a] sm:$0xff] }
 0x113   : > { %1818 = vrot.lane.b32.xlu1 %v3625_v11, %s3031_s8  ;;  %1816 = vrot.lane.b32.xlu0 %v3628_v12, %s3031_s8 }
 0x115   : > { %v651_v34 = vpop.permute.xlu1 %650  ;;  %v649_v35 = vpop.permute.xlu0 %648  ;;  %v1927_v36 = vld [vmem:[#allocation2 + $0x30] sm:$0xff]  ;;  %v1928_v37 = vld [vmem:[#allocation2 + $0x38] sm:$0xff] }
 0x116   : > { %738 = vst.msk [vmem:[#allocation2 + $0x48] sm:$0xff] %vm728_vm3, %v651_v34  ;;  %737 = vst.msk [vmem:[#allocation2 + $0x40] sm:$0xff] %vm728_vm3, %v649_v35  ;;  %v1956_v38 = vpack.c.bf16 %v1928_v37, %v1927_v36 }
 0x117   : > { %473 = vrot.lane.b32.xlu1 %v3609_v3, %s3024_s18  ;;  %471 = vrot.lane.b32.xlu0 %v3612_v4, %s3024_s18  ;;  %v3758_v3 = vld [vmem:[%s3194_s17 + $0xf2] sm:$0xff] }
 0x118   : > { %2795 = vmatmul.mubr.bf16.gmra.mrb[4].mxu0 %v1956_v38 }
 0x119   : > { %v655_v43 = vpop.permute.xlu1 %654  ;;  %v653_v44 = vpop.permute.xlu0 %652 }
 0x11a   : > { %740 = vst.msk [vmem:[#allocation2 + $0x58] sm:$0xff] %vm728_vm3, %v655_v43  ;;  %739 = vst.msk [vmem:[#allocation2 + $0x50] sm:$0xff] %vm728_vm3, %v653_v44 }
 0x11b   : > { %1822 = vrot.lane.b32.xlu1 %v2698_v39, %s3031_s8  ;;  %1820 = vrot.lane.b32.xlu0 %v2697_v40, %s3031_s8 }
 0x11d   : > { %v845_v45 = vpop.permute.xlu1 %844  ;;  %v843_v46 = vpop.permute.xlu0 %842 }
 0x11e   : > { %932 = vst.msk [vmem:[#allocation2 + $0x48] sm:$0xff] %vm922_vm4, %v845_v45  ;;  %931 = vst.msk [vmem:[#allocation2 + $0x40] sm:$0xff] %vm922_vm4, %v843_v46 }
 0x11f   : > { %477 = vrot.lane.b32.xlu1 %v3665_v23, %s3024_s18  ;;  %475 = vrot.lane.b32.xlu0 %v3668_v24, %s3024_s18 }
 0x121   : > { %v849_v49 = vpop.permute.xlu1 %848  ;;  %v847_v50 = vpop.permute.xlu0 %846 }
 0x122   : > { %934 = vst.msk [vmem:[#allocation2 + $0x58] sm:$0xff] %vm922_vm4, %v849_v49  ;;  %933 = vst.msk [vmem:[#allocation2 + $0x50] sm:$0xff] %vm922_vm4, %v847_v50 }
 0x123   : > { %666 = vrot.lane.b32.xlu1 %v3625_v11, %s3025_s19  ;;  %664 = vrot.lane.b32.xlu0 %v3628_v12, %s3025_s19  ;;  %v3775_v12 = vld [vmem:[%s3194_s17 + $0x170] sm:$0xff] }
 0x124   : > { %374 = vst.msk [vmem:[#allocation2 + $0xf8] sm:$0xff] %vm342_vm1, %v3775_v12 }
 0x125   : > { %v1038_v51 = vpop.permute.xlu1 %1037  ;;  %v1036_v52 = vpop.permute.xlu0 %1035 }
 0x126   : > { %1125 = vst.msk [vmem:[#allocation2 + $0x48] sm:$0xff] %vm1115_vm5, %v1038_v51  ;;  %1124 = vst.msk [vmem:[#allocation2 + $0x40] sm:$0xff] %vm1115_vm5, %v1036_v52 }
 0x127   : > { %670 = vrot.lane.b32.xlu1 %v2698_v39, %s3025_s19  ;;  %668 = vrot.lane.b32.xlu0 %v2697_v40, %s3025_s19 }
 0x129   : > { %v1042_v53 = vpop.permute.xlu1 %1041  ;;  %v1040_v54 = vpop.permute.xlu0 %1039 }
 0x12a   : > { %1127 = vst.msk [vmem:[#allocation2 + $0x58] sm:$0xff] %vm1115_vm5, %v1042_v53  ;;  %1126 = vst.msk [vmem:[#allocation2 + $0x50] sm:$0xff] %vm1115_vm5, %v1040_v54 }
 0x12b   : > { %860 = vrot.lane.b32.xlu1 %v3385_v47, %s3026_s20  ;;  %858 = vrot.lane.b32.xlu0 %v3388_v48, %s3026_s20  ;;  %v3726_v47 = vld [vmem:[%s3194_s17 + $0x150] sm:$0xff] }
 0x12c   : > { %371 = vst.msk [vmem:[#allocation2 + $0xe0] sm:$0xff] %vm342_vm1, %v3726_v47 }
 0x12d   : > { %v1231_v55 = vpop.permute.xlu1 %1230  ;;  %v1229_v56 = vpop.permute.xlu0 %1228 }
 0x12e   : > { %1318 = vst.msk [vmem:[#allocation2 + $0x48] sm:$0xff] %vm1308_vm6, %v1231_v55  ;;  %1317 = vst.msk [vmem:[#allocation2 + $0x40] sm:$0xff] %vm1308_vm6, %v1229_v56  ;;  %v3875_v56 = vld [vmem:[%s3194_s17 + $0x12a] sm:$0xff] }
 0x12f   : > { %864 = vrot.lane.b32.xlu1 %v3457_v8, %s3026_s20  ;;  %862 = vrot.lane.b32.xlu0 %v3460_v9, %s3026_s20 }
 0x131   : > { %v1235_v48 = vpop.permute.xlu1 %1234  ;;  %v1233_v58 = vpop.permute.xlu0 %1232 }
 0x132   : > { %1320 = vst.msk [vmem:[#allocation2 + $0x58] sm:$0xff] %vm1308_vm6, %v1235_v48  ;;  %1319 = vst.msk [vmem:[#allocation2 + $0x50] sm:$0xff] %vm1308_vm6, %v1233_v58  ;;  %v3878_v48 = vld [vmem:[%s3194_s17 + $0x122] sm:$0xff] }
 0x133   : > { %1053 = vrot.lane.b32.xlu1 %v3665_v23, %s3027_s21  ;;  %1051 = vrot.lane.b32.xlu0 %v3668_v24, %s3027_s21 }
 0x135   : > { %v1425_v61 = vpop.permute.xlu1 %1424  ;;  %v1423_v62 = vpop.permute.xlu0 %1422 }
 0x136   : > { %1512 = vst.msk [vmem:[#allocation2 + $0x48] sm:$0xff] %vm1502_vm7, %v1425_v61  ;;  %1511 = vst.msk [vmem:[#allocation2 + $0x40] sm:$0xff] %vm1502_vm7, %v1423_v62 }
 0x137   : > { %1057 = vrot.lane.b32.xlu1 %v3739_v59, %s3027_s21  ;;  %1055 = vrot.lane.b32.xlu0 %v3742_v60, %s3027_s21 }
 0x139   : > { %v1429_v63 = vpop.permute.xlu1 %1428  ;;  %v1427_v31 = vpop.permute.xlu0 %1426 }
 0x13a   : > { %1514 = vst.msk [vmem:[#allocation2 + $0x58] sm:$0xff] %vm1502_vm7, %v1429_v63  ;;  %1513 = vst.msk [vmem:[#allocation2 + $0x50] sm:$0xff] %vm1502_vm7, %v1427_v31 }
 0x13b   : > { %1246 = vrot.lane.b32.xlu1 %v2698_v39, %s3028_s9  ;;  %1244 = vrot.lane.b32.xlu0 %v2697_v40, %s3028_s9 }
 0x13d   : > { %v1618_v4 = vpop.permute.xlu1 %1617  ;;  %v1616_v5 = vpop.permute.xlu0 %1615 }
 0x13e   : > { %1705 = vst.msk [vmem:[#allocation2 + $0x48] sm:$0xff] %vm1695_vm8, %v1618_v4  ;;  %1704 = vst.msk [vmem:[#allocation2 + $0x40] sm:$0xff] %vm1695_vm8, %v1616_v5 }
 0x13f   : > { %1250 = vrot.lane.b32.xlu1 %v3755_v32, %s3028_s9  ;;  %1248 = vrot.lane.b32.xlu0 %v3758_v3, %s3028_s9 }
 0x141   : > { %v1622_v6 = vpop.permute.xlu1 %1621  ;;  %v1620_v7 = vpop.permute.xlu0 %1619 }
 0x142   : > { %1707 = vst.msk [vmem:[#allocation2 + $0x58] sm:$0xff] %vm1695_vm8, %v1622_v6  ;;  %1706 = vst.msk [vmem:[#allocation2 + $0x50] sm:$0xff] %vm1695_vm8, %v1620_v7 }
 0x143   : > { %1440 = vrot.lane.b32.xlu1 %v3457_v8, %s3029_s22  ;;  %1438 = vrot.lane.b32.xlu0 %v3460_v9, %s3029_s22  ;;  %v3782_v8 = vld [vmem:[%s3194_s17 + $0x168] sm:$0xff] }
 0x144   : > { %373 = vst.msk [vmem:[#allocation2 + $0xf0] sm:$0xff] %vm342_vm1, %v3782_v8 }
 0x145   : > { %v1811_v10 = vpop.permute.xlu1 %1810  ;;  %v1809_v11 = vpop.permute.xlu0 %1808 }
 0x146   : > { %1898 = vst.msk [vmem:[#allocation2 + $0x48] sm:$0xff] %vm1888_vm9, %v1811_v10  ;;  %1897 = vst.msk [vmem:[#allocation2 + $0x40] sm:$0xff] %vm1888_vm9, %v1809_v11 }
 0x147   : > { %1444 = vrot.lane.b32.xlu1 %v3515_v28, %s3029_s22  ;;  %1442 = vrot.lane.b32.xlu0 %v3518_v29, %s3029_s22 }
 0x149   : > { %v466_v9 = vpop.permute.xlu1 %465  ;;  %v464_v13 = vpop.permute.xlu0 %463 }
 0x14a   : > { %549 = vst.msk [vmem:[#allocation2 + $0x68] sm:$0xff] %vm535_vm2, %v466_v9  ;;  %548 = vst.msk [vmem:[#allocation2 + $0x60] sm:$0xff] %vm535_vm2, %v464_v13 }
 0x14b   : > { %1633 = vrot.lane.b32.xlu1 %v3739_v59, %s3030_s14  ;;  %1631 = vrot.lane.b32.xlu0 %v3742_v60, %s3030_s14 }
 0x14d   : > { %v1815_v16 = vpop.permute.xlu1 %1814  ;;  %v1813_v17 = vpop.permute.xlu0 %1812  ;;  %v1929_v18 = vld [vmem:[#allocation2 + $0x40] sm:$0xff]  ;;  %v1930_v41 = vld [vmem:[#allocation2 + $0x48] sm:$0xff] }
 0x14e   : > { %1900 = vst.msk [vmem:[#allocation2 + $0x58] sm:$0xff] %vm1888_vm9, %v1815_v16  ;;  %1899 = vst.msk [vmem:[#allocation2 + $0x50] sm:$0xff] %vm1888_vm9, %v1813_v17  ;;  %v1957_v42 = vpack.c.bf16 %v1930_v41, %v1929_v18  ;;  %v3929_v17 = vld [vmem:[%s3194_s17 + $0x142] sm:$0xff]  ;;  %v3932_v18 = vld [vmem:[%s3194_s17 + $0x13a] sm:$0xff] }
 0x14f   : > { %1637 = vrot.lane.b32.xlu1 %v3795_v14, %s3030_s14  ;;  %1635 = vrot.lane.b32.xlu0 %v3798_v15, %s3030_s14 }
 0x150   : > { %2798 = vmatprep.mubr.bf16.mxu0 %v1957_v42 }
 0x151   : > { %v470_v23 = vpop.permute.xlu1 %469  ;;  %v468_v24 = vpop.permute.xlu0 %467 }
 0x152   : > { %551 = vst.msk [vmem:[#allocation2 + $0x78] sm:$0xff] %vm535_vm2, %v470_v23  ;;  %550 = vst.msk [vmem:[#allocation2 + $0x70] sm:$0xff] %vm535_vm2, %v468_v24 }
 0x153   : > { %1826 = vrot.lane.b32.xlu1 %v3755_v32, %s3031_s8  ;;  %1824 = vrot.lane.b32.xlu0 %v3758_v3, %s3031_s8 }
 0x155   : > { %v659_v25 = vpop.permute.xlu1 %658  ;;  %v657_v26 = vpop.permute.xlu0 %656  ;;  %v1931_v27 = vld [vmem:[#allocation2 + $0x50] sm:$0xff]  ;;  %v1932_v21 = vld [vmem:[#allocation2 + $0x58] sm:$0xff] }
 0x156   : > { %742 = vst.msk [vmem:[#allocation2 + $0x68] sm:$0xff] %vm728_vm3, %v659_v25  ;;  %741 = vst.msk [vmem:[#allocation2 + $0x60] sm:$0xff] %vm728_vm3, %v657_v26  ;;  %v1958_v22 = vpack.c.bf16 %v1932_v21, %v1931_v27 }
 0x157   : > { %481 = vrot.lane.b32.xlu1 %v3739_v59, %s3024_s18  ;;  %479 = vrot.lane.b32.xlu0 %v3742_v60, %s3024_s18 }
 0x158   : > { %2799 = vmatmul.mubr.bf16.gmra.mrb[8].mxu0 %v1958_v22 }
 0x159   : > { %v663_v34 = vpop.permute.xlu1 %662  ;;  %v661_v35 = vpop.permute.xlu0 %660 }
 0x15a   : > { %744 = vst.msk [vmem:[#allocation2 + $0x78] sm:$0xff] %vm728_vm3, %v663_v34  ;;  %743 = vst.msk [vmem:[#allocation2 + $0x70] sm:$0xff] %vm728_vm3, %v661_v35  ;;  %v3967_v34 = vld [vmem:[%s4389_s2] ss:$0 sm:$0xff] }
 0x15b   : > { %1830 = vrot.lane.b32.xlu1 %v2702_v30, %s3031_s8  ;;  %1828 = vrot.lane.b32.xlu0 %v2701_v33, %s3031_s8 }
 0x15d   : > { %v853_v36 = vpop.permute.xlu1 %852  ;;  %v851_v37 = vpop.permute.xlu0 %850 }
 0x15e   : > { %936 = vst.msk [vmem:[#allocation2 + $0x68] sm:$0xff] %vm922_vm4, %v853_v36  ;;  %935 = vst.msk [vmem:[#allocation2 + $0x60] sm:$0xff] %vm922_vm4, %v851_v37 }
 0x15f   : > { %485 = vrot.lane.b32.xlu1 %v3795_v14, %s3024_s18  ;;  %483 = vrot.lane.b32.xlu0 %v3798_v15, %s3024_s18 }
 0x161   : > { %v857_v38 = vpop.permute.xlu1 %856  ;;  %v855_v39 = vpop.permute.xlu0 %854 }
 0x162   : > { %938 = vst.msk [vmem:[#allocation2 + $0x78] sm:$0xff] %vm922_vm4, %v857_v38  ;;  %937 = vst.msk [vmem:[#allocation2 + $0x70] sm:$0xff] %vm922_vm4, %v855_v39 }
 0x163   : > { %674 = vrot.lane.b32.xlu1 %v3755_v32, %s3025_s19  ;;  %672 = vrot.lane.b32.xlu0 %v3758_v3, %s3025_s19 }
 0x165   : > { %v1046_v40 = vpop.permute.xlu1 %1045  ;;  %v1044_v43 = vpop.permute.xlu0 %1043 }
 0x166   : > { %1129 = vst.msk [vmem:[#allocation2 + $0x68] sm:$0xff] %vm1115_vm5, %v1046_v40  ;;  %1128 = vst.msk [vmem:[#allocation2 + $0x60] sm:$0xff] %vm1115_vm5, %v1044_v43 }
 0x167   : > { %678 = vrot.lane.b32.xlu1 %v2702_v30, %s3025_s19  ;;  %676 = vrot.lane.b32.xlu0 %v2701_v33, %s3025_s19 }
 0x169   : > { %v1050_v44 = vpop.permute.xlu1 %1049  ;;  %v1048_v45 = vpop.permute.xlu0 %1047 }
 0x16a   : > { %1131 = vst.msk [vmem:[#allocation2 + $0x78] sm:$0xff] %vm1115_vm5, %v1050_v44  ;;  %1130 = vst.msk [vmem:[#allocation2 + $0x70] sm:$0xff] %vm1115_vm5, %v1048_v45 }
 0x16b   : > { %868 = vrot.lane.b32.xlu1 %v3515_v28, %s3026_s20  ;;  %866 = vrot.lane.b32.xlu0 %v3518_v29, %s3026_s20  ;;  %v3859_v28 = vld [vmem:[%s3194_s17 + $0x129] sm:$0xff]  ;;  %v3862_v29 = vld [vmem:[%s3194_s17 + $0x121] sm:$0xff] }
 0x16d   : > { %v1239_v46 = vpop.permute.xlu1 %1238  ;;  %v1237_v49 = vpop.permute.xlu0 %1236 }
 0x16e   : > { %1322 = vst.msk [vmem:[#allocation2 + $0x68] sm:$0xff] %vm1308_vm6, %v1239_v46  ;;  %1321 = vst.msk [vmem:[#allocation2 + $0x60] sm:$0xff] %vm1308_vm6, %v1237_v49 }
 0x16f   : > { %872 = vrot.lane.b32.xlu1 %v3589_v1, %s3026_s20  ;;  %870 = vrot.lane.b32.xlu0 %v3592_v2, %s3026_s20 }
 0x171   : > { %v1243_v50 = vpop.permute.xlu1 %1242  ;;  %v1241_v51 = vpop.permute.xlu0 %1240 }
 0x172   : > { %1324 = vst.msk [vmem:[#allocation2 + $0x78] sm:$0xff] %vm1308_vm6, %v1243_v50  ;;  %1323 = vst.msk [vmem:[#allocation2 + $0x70] sm:$0xff] %vm1308_vm6, %v1241_v51 }
 0x173   : > { %1061 = vrot.lane.b32.xlu1 %v3795_v14, %s3027_s21  ;;  %1059 = vrot.lane.b32.xlu0 %v3798_v15, %s3027_s21 }
 0x175   : > { %v1433_v52 = vpop.permute.xlu1 %1432  ;;  %v1431_v53 = vpop.permute.xlu0 %1430 }
 0x176   : > { %1516 = vst.msk [vmem:[#allocation2 + $0x68] sm:$0xff] %vm1502_vm7, %v1433_v52  ;;  %1515 = vst.msk [vmem:[#allocation2 + $0x60] sm:$0xff] %vm1502_vm7, %v1431_v53 }
 0x177   : > { %1065 = vrot.lane.b32.xlu1 %v3859_v28, %s3027_s21  ;;  %1063 = vrot.lane.b32.xlu0 %v3862_v29, %s3027_s21 }
 0x179   : > { %v1437_v54 = vpop.permute.xlu1 %1436  ;;  %v1435_v55 = vpop.permute.xlu0 %1434 }
 0x17a   : > { %1518 = vst.msk [vmem:[#allocation2 + $0x78] sm:$0xff] %vm1502_vm7, %v1437_v54  ;;  %1517 = vst.msk [vmem:[#allocation2 + $0x70] sm:$0xff] %vm1502_vm7, %v1435_v55 }
 0x17b   : > { %1254 = vrot.lane.b32.xlu1 %v2702_v30, %s3028_s9  ;;  %1252 = vrot.lane.b32.xlu0 %v2701_v33, %s3028_s9 }
 0x17d   : > { %v1626_v58 = vpop.permute.xlu1 %1625  ;;  %v1624_v59 = vpop.permute.xlu0 %1623 }
 0x17e   : > { %1709 = vst.msk [vmem:[#allocation2 + $0x68] sm:$0xff] %vm1695_vm8, %v1626_v58  ;;  %1708 = vst.msk [vmem:[#allocation2 + $0x60] sm:$0xff] %vm1695_vm8, %v1624_v59  ;;  %v4006_v59 = vld [vmem:[%s3194_s17 + $0x15a] sm:$0xff] }
 0x17f   : > { %1258 = vrot.lane.b32.xlu1 %v3875_v56, %s3028_s9  ;;  %1256 = vrot.lane.b32.xlu0 %v3878_v48, %s3028_s9 }
 0x181   : > { %v1630_v60 = vpop.permute.xlu1 %1629  ;;  %v1628_v61 = vpop.permute.xlu0 %1627 }
 0x182   : > { %1711 = vst.msk [vmem:[#allocation2 + $0x78] sm:$0xff] %vm1695_vm8, %v1630_v60  ;;  %1710 = vst.msk [vmem:[#allocation2 + $0x70] sm:$0xff] %vm1695_vm8, %v1628_v61  ;;  %v4009_v60 = vld [vmem:[%s3194_s17 + $0x152] sm:$0xff] }
 0x183   : > { %1448 = vrot.lane.b32.xlu1 %v3589_v1, %s3029_s22  ;;  %1446 = vrot.lane.b32.xlu0 %v3592_v2, %s3029_s22  ;;  %v3905_v1 = vld [vmem:[%s3194_s17 + $0x141] sm:$0xff]  ;;  %v3908_v2 = vld [vmem:[%s3194_s17 + $0x139] sm:$0xff] }
 0x185   : > { %v1819_v62 = vpop.permute.xlu1 %1818  ;;  %v1817_v63 = vpop.permute.xlu0 %1816 }
 0x186   : > { %1902 = vst.msk [vmem:[#allocation2 + $0x68] sm:$0xff] %vm1888_vm9, %v1819_v62  ;;  %1901 = vst.msk [vmem:[#allocation2 + $0x60] sm:$0xff] %vm1888_vm9, %v1817_v63 }
 0x187   : > { %1452 = vrot.lane.b32.xlu1 %v3645_v19, %s3029_s22  ;;  %1450 = vrot.lane.b32.xlu0 %v3648_v20, %s3029_s22 }
 0x189   : > { %v474_v31 = vpop.permute.xlu1 %473  ;;  %v472_v32 = vpop.permute.xlu0 %471 }
 0x18a   : > { %553 = vst.msk [vmem:[#allocation2 + $0x88] sm:$0xff] %vm535_vm2, %v474_v31  ;;  %552 = vst.msk [vmem:[#allocation2 + $0x80] sm:$0xff] %vm535_vm2, %v472_v32 }
 0x18b   : > { %1641 = vrot.lane.b32.xlu1 %v3859_v28, %s3030_s14  ;;  %1639 = vrot.lane.b32.xlu0 %v3862_v29, %s3030_s14 }
 0x18d   : > { %v1823_v3 = vpop.permute.xlu1 %1822  ;;  %v1821_v4 = vpop.permute.xlu0 %1820  ;;  %v1933_v5 = vld [vmem:[#allocation2 + $0x60] sm:$0xff]  ;;  %v1934_v6 = vld [vmem:[#allocation2 + $0x68] sm:$0xff] }
 0x18e   : > { %1904 = vst.msk [vmem:[#allocation2 + $0x78] sm:$0xff] %vm1888_vm9, %v1823_v3  ;;  %1903 = vst.msk [vmem:[#allocation2 + $0x70] sm:$0xff] %vm1888_vm9, %v1821_v4  ;;  %v1959_v7 = vpack.c.bf16 %v1934_v6, %v1933_v5 }
 0x18f   : > { %1645 = vrot.lane.b32.xlu1 %v3905_v1, %s3030_s14  ;;  %1643 = vrot.lane.b32.xlu0 %v3908_v2, %s3030_s14 }
 0x190   : > { %2802 = vmatprep.mubr.bf16.mxu0 %v1959_v7 }
 0x191   : > { %v478_v10 = vpop.permute.xlu1 %477  ;;  %v476_v11 = vpop.permute.xlu0 %475 }
 0x192   : > { %555 = vst.msk [vmem:[#allocation2 + $0x98] sm:$0xff] %vm535_vm2, %v478_v10  ;;  %554 = vst.msk [vmem:[#allocation2 + $0x90] sm:$0xff] %vm535_vm2, %v476_v11 }
 0x193   : > { %1834 = vrot.lane.b32.xlu1 %v3875_v56, %s3031_s8  ;;  %1832 = vrot.lane.b32.xlu0 %v3878_v48, %s3031_s8 }
 0x195   : > { %v667_v9 = vpop.permute.xlu1 %666  ;;  %v665_v13 = vpop.permute.xlu0 %664  ;;  %v1935_v14 = vld [vmem:[#allocation2 + $0x70] sm:$0xff]  ;;  %v1936_v15 = vld [vmem:[#allocation2 + $0x78] sm:$0xff] }
 0x196   : > { %746 = vst.msk [vmem:[#allocation2 + $0x88] sm:$0xff] %vm728_vm3, %v667_v9  ;;  %745 = vst.msk [vmem:[#allocation2 + $0x80] sm:$0xff] %vm728_vm3, %v665_v13  ;;  %v1960_v16 = vpack.c.bf16 %v1936_v15, %v1935_v14 }
 0x197   : > { %489 = vrot.lane.b32.xlu1 %v3859_v28, %s3024_s18  ;;  %487 = vrot.lane.b32.xlu0 %v3862_v29, %s3024_s18  ;;  %v3986_v28 = vld [vmem:[%s3194_s17 + $0x159] sm:$0xff]  ;;  %v3989_v29 = vld [vmem:[%s3194_s17 + $0x151] sm:$0xff] }
 0x198   : > { %2803 = vmatmul.mubr.bf16.gmra.mrb[12].mxu0 %v1960_v16 }
 0x199   : > { %v671_v41 = vpop.permute.xlu1 %670  ;;  %v669_v42 = vpop.permute.xlu0 %668 }
 0x19a   : > { %748 = vst.msk [vmem:[#allocation2 + $0x98] sm:$0xff] %vm728_vm3, %v671_v41  ;;  %747 = vst.msk [vmem:[#allocation2 + $0x90] sm:$0xff] %vm728_vm3, %v669_v42  ;;  %v4063_v41 = vld [vmem:[%s3194_s17 + $0x16a] sm:$0xff] }
 0x19b   : > { %1838 = vrot.lane.b32.xlu1 %v3929_v17, %s3031_s8  ;;  %1836 = vrot.lane.b32.xlu0 %v3932_v18, %s3031_s8 }
 0x19d   : > { %v861_v23 = vpop.permute.xlu1 %860  ;;  %v859_v24 = vpop.permute.xlu0 %858 }
 0x19e   : > { %940 = vst.msk [vmem:[#allocation2 + $0x88] sm:$0xff] %vm922_vm4, %v861_v23  ;;  %939 = vst.msk [vmem:[#allocation2 + $0x80] sm:$0xff] %vm922_vm4, %v859_v24 }
 0x19f   : > { %493 = vrot.lane.b32.xlu1 %v3905_v1, %s3024_s18  ;;  %491 = vrot.lane.b32.xlu0 %v3908_v2, %s3024_s18 }
 0x1a1   : > { %v865_v25 = vpop.permute.xlu1 %864  ;;  %v863_v26 = vpop.permute.xlu0 %862 }
 0x1a2   : > { %942 = vst.msk [vmem:[#allocation2 + $0x98] sm:$0xff] %vm922_vm4, %v865_v25  ;;  %941 = vst.msk [vmem:[#allocation2 + $0x90] sm:$0xff] %vm922_vm4, %v863_v26 }
 0x1a3   : > { %682 = vrot.lane.b32.xlu1 %v3875_v56, %s3025_s19  ;;  %680 = vrot.lane.b32.xlu0 %v3878_v48, %s3025_s19 }
 0x1a5   : > { %v1054_v27 = vpop.permute.xlu1 %1053  ;;  %v1052_v21 = vpop.permute.xlu0 %1051 }
 0x1a6   : > { %1133 = vst.msk [vmem:[#allocation2 + $0x88] sm:$0xff] %vm1115_vm5, %v1054_v27  ;;  %1132 = vst.msk [vmem:[#allocation2 + $0x80] sm:$0xff] %vm1115_vm5, %v1052_v21 }
 0x1a7   : > { %686 = vrot.lane.b32.xlu1 %v3929_v17, %s3025_s19  ;;  %684 = vrot.lane.b32.xlu0 %v3932_v18, %s3025_s19 }
 0x1a9   : > { %v1058_v22 = vpop.permute.xlu1 %1057  ;;  %v1056_v30 = vpop.permute.xlu0 %1055 }
 0x1aa   : > { %1135 = vst.msk [vmem:[#allocation2 + $0x98] sm:$0xff] %vm1115_vm5, %v1058_v22  ;;  %1134 = vst.msk [vmem:[#allocation2 + $0x90] sm:$0xff] %vm1115_vm5, %v1056_v30 }
 0x1ab   : > { %876 = vrot.lane.b32.xlu1 %v3645_v19, %s3026_s20  ;;  %874 = vrot.lane.b32.xlu0 %v3648_v20, %s3026_s20  ;;  %v2792_v33 = vpop.f32.mrb[0].mxu0 }
 0x1ac   : > { %v2074_v35 = vpop.f32.mrb[1].mxu0  ;;  %v2083_v20 = vadd.f32 %v2792_v33, %v3967_v34 }
 0x1ad   : > { %v1247_v36 = vpop.permute.xlu1 %1246  ;;  %v1245_v37 = vpop.permute.xlu0 %1244  ;;  %v2075_v38 = vadd.f32 %v3967_v34, %v2074_v35 }
 0x1ae   : > { %1326 = vst.msk [vmem:[#allocation2 + $0x88] sm:$0xff] %vm1308_vm6, %v1247_v36  ;;  %1325 = vst.msk [vmem:[#allocation2 + $0x80] sm:$0xff] %vm1308_vm6, %v1245_v37  ;;  %v2793_v39 = vpop.f32.mrb[2].mxu0  ;;  %v2203_v50 = vmax.f32 %v2083_v20, 0.0  ;;  %v2554_v37 = vld [vmem:[%s3194_s17 + $0x188] sm:$0xff] }
 0x1af   : > { %v2077_v19 = vpop.f32.mrb[3].mxu0  ;;  %880 = vrot.lane.b32.xlu1 %v3723_v57, %s3026_s20  ;;  %878 = vrot.lane.b32.xlu0 %v3726_v47, %s3026_s20  ;;  %v2201_v45 = vmax.f32 %v2075_v38, 0.0  ;;  %v2086_v46 = vadd.f32 %v2793_v39, %v3967_v34  ;;  %v2553_v38 = vld [vmem:[%s3194_s17 + $0x180] sm:$0xff] }
 0x1b0   : > { %v2078_v40 = vadd.f32 %v3967_v34, %v2077_v19 }
 0x1b1   : > { %v1251_v43 = vpop.permute.xlu1 %1250  ;;  %v1249_v44 = vpop.permute.xlu0 %1248  ;;  %v2204_v54 = vmax.f32 %v2086_v46, 0.0 }
 0x1b2   : > { %v2202_v49 = vmax.f32 %v2078_v40, 0.0  ;;  %1328 = vst.msk [vmem:[#allocation2 + $0x98] sm:$0xff] %vm1308_vm6, %v1251_v43  ;;  %1327 = vst.msk [vmem:[#allocation2 + $0x90] sm:$0xff] %vm1308_vm6, %v1249_v44 }
 0x1b3   : > { %1069 = vrot.lane.b32.xlu1 %v3905_v1, %s3027_s21  ;;  %1067 = vrot.lane.b32.xlu0 %v3908_v2, %s3027_s21 }
 0x1b4   : > { %v2233_v51 = vadd.f32 %v2202_v49, %v2201_v45 }
 0x1b5   : > { %v1441_v52 = vpop.permute.xlu1 %1440  ;;  %v1439_v53 = vpop.permute.xlu0 %1438 }
 0x1b6   : > { %v2234_v55 = vadd.f32 %v2233_v51, %v2203_v50  ;;  %1520 = vst.msk [vmem:[#allocation2 + $0x88] sm:$0xff] %vm1502_vm7, %v1441_v52  ;;  %1519 = vst.msk [vmem:[#allocation2 + $0x80] sm:$0xff] %vm1502_vm7, %v1439_v53  ;;  %v2586_v52 = vld [vmem:[%s3194_s17 + $0x189] sm:$0xff]  ;;  %v2585_v53 = vld [vmem:[%s3194_s17 + $0x181] sm:$0xff] }
 0x1b7   : > { %1073 = vrot.lane.b32.xlu1 %v3986_v28, %s3027_s21  ;;  %1071 = vrot.lane.b32.xlu0 %v3989_v29, %s3027_s21 }
 0x1b8   : > { %v3997_v56 = vadd.f32 %v2234_v55, %v2204_v54 }
 0x1b9   : > { %v1445_v48 = vpop.permute.xlu1 %1444  ;;  %v1443_v58 = vpop.permute.xlu0 %1442 }
 0x1ba   : > { %1522 = vst.msk [vmem:[#allocation2 + $0x98] sm:$0xff] %vm1502_vm7, %v1445_v48  ;;  %1521 = vst.msk [vmem:[#allocation2 + $0x90] sm:$0xff] %vm1502_vm7, %v1443_v58 }
 0x1bb   : > { %1262 = vrot.lane.b32.xlu1 %v3929_v17, %s3028_s9  ;;  %1260 = vrot.lane.b32.xlu0 %v3932_v18, %s3028_s9  ;;  %v4060_v18 = vld [vmem:[%s3194_s17 + $0x172] sm:$0xff] }
 0x1bd   : > { %v1634_v61 = vpop.permute.xlu1 %1633  ;;  %v1632_v62 = vpop.permute.xlu0 %1631 }
 0x1be   : > { %1713 = vst.msk [vmem:[#allocation2 + $0x88] sm:$0xff] %vm1695_vm8, %v1634_v61  ;;  %1712 = vst.msk [vmem:[#allocation2 + $0x80] sm:$0xff] %vm1695_vm8, %v1632_v62  ;;  %v2618_v61 = vld [vmem:[%s3194_s17 + $0x18a] sm:$0xff]  ;;  %v2617_v62 = vld [vmem:[%s3194_s17 + $0x182] sm:$0xff] }
 0x1bf   : > { %1266 = vrot.lane.b32.xlu1 %v4006_v59, %s3028_s9  ;;  %1264 = vrot.lane.b32.xlu0 %v4009_v60, %s3028_s9 }
 0x1c1   : > { %v1638_v63 = vpop.permute.xlu1 %1637  ;;  %v1636_v31 = vpop.permute.xlu0 %1635 }
 0x1c2   : > { %1715 = vst.msk [vmem:[#allocation2 + $0x98] sm:$0xff] %vm1695_vm8, %v1638_v63  ;;  %1714 = vst.msk [vmem:[#allocation2 + $0x90] sm:$0xff] %vm1695_vm8, %v1636_v31 }
 0x1c3   : > { %1456 = vrot.lane.b32.xlu1 %v3723_v57, %s3029_s22  ;;  %1454 = vrot.lane.b32.xlu0 %v3726_v47, %s3029_s22  ;;  %v4036_v57 = vld [vmem:[%s3194_s17 + $0x171] sm:$0xff]  ;;  %v4039_v47 = vld [vmem:[%s3194_s17 + $0x169] sm:$0xff] }
 0x1c5   : > { %v1827_v32 = vpop.permute.xlu1 %1826  ;;  %v1825_v1 = vpop.permute.xlu0 %1824 }
 0x1c6   : > { %1906 = vst.msk [vmem:[#allocation2 + $0x88] sm:$0xff] %vm1888_vm9, %v1827_v32  ;;  %1905 = vst.msk [vmem:[#allocation2 + $0x80] sm:$0xff] %vm1888_vm9, %v1825_v1 }
 0x1c7   : > { %1460 = vrot.lane.b32.xlu1 %v3775_v12, %s3029_s22  ;;  %1458 = vrot.lane.b32.xlu0 %v3782_v8, %s3029_s22 }
 0x1c9   : > { %v482_v2 = vpop.permute.xlu1 %481  ;;  %v480_v3 = vpop.permute.xlu0 %479 }
 0x1ca   : > { %557 = vst.msk [vmem:[#allocation2 + $0xa8] sm:$0xff] %vm535_vm2, %v482_v2  ;;  %556 = vst.msk [vmem:[#allocation2 + $0xa0] sm:$0xff] %vm535_vm2, %v480_v3  ;;  %v2650_v2 = vld [vmem:[%s3194_s17 + $0x1a0] sm:$0xff]  ;;  %v2649_v3 = vld [vmem:[%s3194_s17 + $0x198] sm:$0xff] }
 0x1cb   : > { %1649 = vrot.lane.b32.xlu1 %v3986_v28, %s3030_s14  ;;  %1647 = vrot.lane.b32.xlu0 %v3989_v29, %s3030_s14 }
 0x1cd   : > { %v1831_v4 = vpop.permute.xlu1 %1830  ;;  %v1829_v5 = vpop.permute.xlu0 %1828  ;;  %v1937_v6 = vld [vmem:[#allocation2 + $0x80] sm:$0xff]  ;;  %v1938_v7 = vld [vmem:[#allocation2 + $0x88] sm:$0xff] }
 0x1ce   : > { %1908 = vst.msk [vmem:[#allocation2 + $0x98] sm:$0xff] %vm1888_vm9, %v1831_v4  ;;  %1907 = vst.msk [vmem:[#allocation2 + $0x90] sm:$0xff] %vm1888_vm9, %v1829_v5  ;;  %v1961_v10 = vpack.c.bf16 %v1938_v7, %v1937_v6  ;;  %v2682_v6 = vld [vmem:[%s3194_s17 + $0x1a1] sm:$0xff]  ;;  %v2681_v7 = vld [vmem:[%s3194_s17 + $0x199] sm:$0xff] }
 0x1cf   : > { %1653 = vrot.lane.b32.xlu1 %v4036_v57, %s3030_s14  ;;  %1651 = vrot.lane.b32.xlu0 %v4039_v47, %s3030_s14 }
 0x1d0   : > { %2806 = vmatprep.mubr.bf16.mxu0 %v1961_v10 }
 0x1d1   : > { %v486_v11 = vpop.permute.xlu1 %485  ;;  %v484_v9 = vpop.permute.xlu0 %483 }
 0x1d2   : > { %559 = vst.msk [vmem:[#allocation2 + $0xb8] sm:$0xff] %vm535_vm2, %v486_v11  ;;  %558 = vst.msk [vmem:[#allocation2 + $0xb0] sm:$0xff] %vm535_vm2, %v484_v9 }
 0x1d3   : > { %1842 = vrot.lane.b32.xlu1 %v4006_v59, %s3031_s8  ;;  %1840 = vrot.lane.b32.xlu0 %v4009_v60, %s3031_s8 }
 0x1d5   : > { %v675_v13 = vpop.permute.xlu1 %674  ;;  %v673_v14 = vpop.permute.xlu0 %672  ;;  %v1939_v15 = vld [vmem:[#allocation2 + $0x90] sm:$0xff]  ;;  %v1940_v16 = vld [vmem:[#allocation2 + $0x98] sm:$0xff] }
 0x1d6   : > { %750 = vst.msk [vmem:[#allocation2 + $0xa8] sm:$0xff] %vm728_vm3, %v675_v13  ;;  %749 = vst.msk [vmem:[#allocation2 + $0xa0] sm:$0xff] %vm728_vm3, %v673_v14  ;;  %v1962_v17 = vpack.c.bf16 %v1940_v16, %v1939_v15 }
 0x1d7   : > { %497 = vrot.lane.b32.xlu1 %v3986_v28, %s3024_s18  ;;  %495 = vrot.lane.b32.xlu0 %v3989_v29, %s3024_s18 }
 0x1d8   : > { %2807 = vmatmul.mubr.bf16.gmra.mrb[16].mxu0 %v1962_v17  ;;  %v2714_v17 = vld [vmem:[%s3194_s17 + $0x1a2] sm:$0xff] }
 0x1d9   : > { %v679_v42 = vpop.permute.xlu1 %678  ;;  %v677_v23 = vpop.permute.xlu0 %676 }
 0x1da   : > { %752 = vst.msk [vmem:[#allocation2 + $0xb8] sm:$0xff] %vm728_vm3, %v679_v42  ;;  %751 = vst.msk [vmem:[#allocation2 + $0xb0] sm:$0xff] %vm728_vm3, %v677_v23 }
 0x1db   : > { %1846 = vrot.lane.b32.xlu1 %v4060_v18, %s3031_s8  ;;  %1844 = vrot.lane.b32.xlu0 %v4063_v41, %s3031_s8 }
 0x1dd   : > { %v869_v24 = vpop.permute.xlu1 %868  ;;  %v867_v25 = vpop.permute.xlu0 %866 }
 0x1de   : > { %944 = vst.msk [vmem:[#allocation2 + $0xa8] sm:$0xff] %vm922_vm4, %v869_v24  ;;  %943 = vst.msk [vmem:[#allocation2 + $0xa0] sm:$0xff] %vm922_vm4, %v867_v25 }
 0x1df   : > { %501 = vrot.lane.b32.xlu1 %v4036_v57, %s3024_s18  ;;  %499 = vrot.lane.b32.xlu0 %v4039_v47, %s3024_s18 }
 0x1e1   : > { %v873_v26 = vpop.permute.xlu1 %872  ;;  %v871_v27 = vpop.permute.xlu0 %870 }
 0x1e2   : > { %946 = vst.msk [vmem:[#allocation2 + $0xb8] sm:$0xff] %vm922_vm4, %v873_v26  ;;  %945 = vst.msk [vmem:[#allocation2 + $0xb0] sm:$0xff] %vm922_vm4, %v871_v27 }
 0x1e3   : > { %690 = vrot.lane.b32.xlu1 %v4006_v59, %s3025_s19  ;;  %688 = vrot.lane.b32.xlu0 %v4009_v60, %s3025_s19 }
 0x1e5   : > { %v1062_v21 = vpop.permute.xlu1 %1061  ;;  %v1060_v22 = vpop.permute.xlu0 %1059 }
 0x1e6   : > { %1137 = vst.msk [vmem:[#allocation2 + $0xa8] sm:$0xff] %vm1115_vm5, %v1062_v21  ;;  %1136 = vst.msk [vmem:[#allocation2 + $0xa0] sm:$0xff] %vm1115_vm5, %v1060_v22 }
 0x1e7   : > { %694 = vrot.lane.b32.xlu1 %v4060_v18, %s3025_s19  ;;  %692 = vrot.lane.b32.xlu0 %v4063_v41, %s3025_s19 }
 0x1e9   : > { %v1066_v30 = vpop.permute.xlu1 %1065  ;;  %v1064_v33 = vpop.permute.xlu0 %1063 }
 0x1ea   : > { %1139 = vst.msk [vmem:[#allocation2 + $0xb8] sm:$0xff] %vm1115_vm5, %v1066_v30  ;;  %1138 = vst.msk [vmem:[#allocation2 + $0xb0] sm:$0xff] %vm1115_vm5, %v1064_v33 }
 0x1eb   : > { %884 = vrot.lane.b32.xlu1 %v3775_v12, %s3026_s20  ;;  %882 = vrot.lane.b32.xlu0 %v3782_v8, %s3026_s20  ;;  %v2796_v35 = vpop.f32.mrb[4].mxu0 }
 0x1ec   : > { %v2090_v36 = vpop.f32.mrb[5].mxu0  ;;  %v2099_v12 = vadd.f32 %v2796_v35, %v3967_v34 }
 0x1ed   : > { %v2091_v39 = vadd.f32 %v3967_v34, %v2090_v36  ;;  %v1255_v19 = vpop.permute.xlu1 %1254  ;;  %v1253_v20 = vpop.permute.xlu0 %1252 }
 0x1ee   : > { %1330 = vst.msk [vmem:[#allocation2 + $0xa8] sm:$0xff] %vm1308_vm6, %v1255_v19  ;;  %1329 = vst.msk [vmem:[#allocation2 + $0xa0] sm:$0xff] %vm1308_vm6, %v1253_v20  ;;  %v2797_v40 = vpop.f32.mrb[6].mxu0  ;;  %v2207_v28 = vmax.f32 %v2099_v12, 0.0 }
 0x1ef   : > { %v2205_v43 = vmax.f32 %v2091_v39, 0.0  ;;  %v2093_v44 = vpop.f32.mrb[7].mxu0  ;;  %888 = vrot.lane.b32.xlu1 %v2554_v37, %s3026_s20  ;;  %886 = vrot.lane.b32.xlu0 %v2553_v38, %s3026_s20  ;;  %v2102_v50 = vadd.f32 %v2797_v40, %v3967_v34  ;;  %s2451_s20 = scalar_lea.sflag [#allocation4], %s269_s16 }
 0x1f0   : > { %v2094_v8 = vadd.f32 %v3967_v34, %v2093_v44 }
 0x1f1   : > { %v2236_v45 = vadd.f32 %v3997_v56, %v2205_v43  ;;  %v1259_v46 = vpop.permute.xlu1 %1258  ;;  %v1257_v49 = vpop.permute.xlu0 %1256  ;;  %v2208_v56 = vmax.f32 %v2102_v50, 0.0 }
 0x1f2   : > { %v2206_v51 = vmax.f32 %v2094_v8, 0.0  ;;  %1332 = vst.msk [vmem:[#allocation2 + $0xb8] sm:$0xff] %vm1308_vm6, %v1259_v46  ;;  %1331 = vst.msk [vmem:[#allocation2 + $0xb0] sm:$0xff] %vm1308_vm6, %v1257_v49 }
 0x1f3   : > { %1077 = vrot.lane.b32.xlu1 %v4036_v57, %s3027_s21  ;;  %1075 = vrot.lane.b32.xlu0 %v4039_v47, %s3027_s21 }
 0x1f4   : > { %v2237_v29 = vadd.f32 %v2236_v45, %v2206_v51 }
 0x1f5   : > { %v1449_v54 = vpop.permute.xlu1 %1448  ;;  %v1447_v55 = vpop.permute.xlu0 %1446 }
 0x1f6   : > { %v2238_v48 = vadd.f32 %v2237_v29, %v2207_v28  ;;  %1524 = vst.msk [vmem:[#allocation2 + $0xa8] sm:$0xff] %vm1502_vm7, %v1449_v54  ;;  %1523 = vst.msk [vmem:[#allocation2 + $0xa0] sm:$0xff] %vm1502_vm7, %v1447_v55 }
 0x1f7   : > { %1081 = vrot.lane.b32.xlu1 %v2586_v52, %s3027_s21  ;;  %1079 = vrot.lane.b32.xlu0 %v2585_v53, %s3027_s21  ;;  %s2959_s21 = scalar_lea.vmem %s4347_s15, 16 }
 0x1f8   : > { %v4118_v58 = vadd.f32 %v2238_v48, %v2208_v56  ;;  %p2960_p11 = scmp.ne.s32.totalorder %s4347_s15, %s2959_s21 }
 0x1f9   : > { %v1453_v59 = vpop.permute.xlu1 %1452  ;;  %v1451_v60 = vpop.permute.xlu0 %1450 }
 0x1fa   : > { %1526 = vst.msk [vmem:[#allocation2 + $0xb8] sm:$0xff] %vm1502_vm7, %v1453_v59  ;;  %1525 = vst.msk [vmem:[#allocation2 + $0xb0] sm:$0xff] %vm1502_vm7, %v1451_v60  ;;  %p2961_p12 = pnand %p2960_p11, %p3113_p5 }
 0x1fb   : > { %1270 = vrot.lane.b32.xlu1 %v4060_v18, %s3028_s9  ;;  %1268 = vrot.lane.b32.xlu0 %v4063_v41, %s3028_s9  ;;  %v2713_v18 = vld [vmem:[%s3194_s17 + $0x19a] sm:$0xff] }
 0x1fc   : > { %p2962_p13 = pneg %p2961_p12 }
 0x1fd   : > { %v1642_v63 = vpop.permute.xlu1 %1641  ;;  %v1640_v31 = vpop.permute.xlu0 %1639 }
 0x1fe   : > { %1717 = vst.msk [vmem:[#allocation2 + $0xa8] sm:$0xff] %vm1695_vm8, %v1642_v63  ;;  %1716 = vst.msk [vmem:[#allocation2 + $0xa0] sm:$0xff] %vm1695_vm8, %v1640_v31 }
 0x1ff   : > { %1274 = vrot.lane.b32.xlu1 %v2618_v61, %s3028_s9  ;;  %1272 = vrot.lane.b32.xlu0 %v2617_v62, %s3028_s9 }
 0x201   : > { %v1646_v32 = vpop.permute.xlu1 %1645  ;;  %v1644_v1 = vpop.permute.xlu0 %1643 }
 0x202   : > { %1719 = vst.msk [vmem:[#allocation2 + $0xb8] sm:$0xff] %vm1695_vm8, %v1646_v32  ;;  %1718 = vst.msk [vmem:[#allocation2 + $0xb0] sm:$0xff] %vm1695_vm8, %v1644_v1 }
 0x203   : > { %1464 = vrot.lane.b32.xlu1 %v2554_v37, %s3029_s22  ;;  %1462 = vrot.lane.b32.xlu0 %v2553_v38, %s3029_s22 }
 0x205   : > { %v1835_v57 = vpop.permute.xlu1 %1834  ;;  %v1833_v47 = vpop.permute.xlu0 %1832 }
 0x206   : > { %1910 = vst.msk [vmem:[#allocation2 + $0xa8] sm:$0xff] %vm1888_vm9, %v1835_v57  ;;  %1909 = vst.msk [vmem:[#allocation2 + $0xa0] sm:$0xff] %vm1888_vm9, %v1833_v47 }
 0x207   : > { %1468 = vrot.lane.b32.xlu1 %v2650_v2, %s3029_s22  ;;  %1466 = vrot.lane.b32.xlu0 %v2649_v3, %s3029_s22 }
 0x209   : > { %v490_v4 = vpop.permute.xlu1 %489  ;;  %v488_v5 = vpop.permute.xlu0 %487 }
 0x20a   : > { %561 = vst.msk [vmem:[#allocation2 + $0xc8] sm:$0xff] %vm535_vm2, %v490_v4  ;;  %560 = vst.msk [vmem:[#allocation2 + $0xc0] sm:$0xff] %vm535_vm2, %v488_v5 }
 0x20b   : > { %1657 = vrot.lane.b32.xlu1 %v2586_v52, %s3030_s14  ;;  %1655 = vrot.lane.b32.xlu0 %v2585_v53, %s3030_s14 }
 0x20d   : > { %v1839_v10 = vpop.permute.xlu1 %1838  ;;  %v1837_v11 = vpop.permute.xlu0 %1836  ;;  %v1941_v9 = vld [vmem:[#allocation2 + $0xa0] sm:$0xff]  ;;  %v1942_v13 = vld [vmem:[#allocation2 + $0xa8] sm:$0xff] }
 0x20e   : > { %1912 = vst.msk [vmem:[#allocation2 + $0xb8] sm:$0xff] %vm1888_vm9, %v1839_v10  ;;  %1911 = vst.msk [vmem:[#allocation2 + $0xb0] sm:$0xff] %vm1888_vm9, %v1837_v11  ;;  %v1963_v14 = vpack.c.bf16 %v1942_v13, %v1941_v9 }
 0x20f   : > { %1661 = vrot.lane.b32.xlu1 %v2682_v6, %s3030_s14  ;;  %1659 = vrot.lane.b32.xlu0 %v2681_v7, %s3030_s14 }
 0x210   : > { %2810 = vmatprep.mubr.bf16.mxu0 %v1963_v14 }
 0x211   : > { %v494_v15 = vpop.permute.xlu1 %493  ;;  %v492_v16 = vpop.permute.xlu0 %491 }
 0x212   : > { %563 = vst.msk [vmem:[#allocation2 + $0xd8] sm:$0xff] %vm535_vm2, %v494_v15  ;;  %562 = vst.msk [vmem:[#allocation2 + $0xd0] sm:$0xff] %vm535_vm2, %v492_v16 }
 0x213   : > { %1850 = vrot.lane.b32.xlu1 %v2618_v61, %s3031_s8  ;;  %1848 = vrot.lane.b32.xlu0 %v2617_v62, %s3031_s8 }
 0x215   : > { %v683_v41 = vpop.permute.xlu1 %682  ;;  %v681_v42 = vpop.permute.xlu0 %680  ;;  %v1943_v23 = vld [vmem:[#allocation2 + $0xb0] sm:$0xff]  ;;  %v1944_v24 = vld [vmem:[#allocation2 + $0xb8] sm:$0xff] }
 0x216   : > { %754 = vst.msk [vmem:[#allocation2 + $0xc8] sm:$0xff] %vm728_vm3, %v683_v41  ;;  %753 = vst.msk [vmem:[#allocation2 + $0xc0] sm:$0xff] %vm728_vm3, %v681_v42  ;;  %v1964_v25 = vpack.c.bf16 %v1944_v24, %v1943_v23 }
 0x217   : > { %1854 = vrot.lane.b32.xlu1 %v2714_v17, %s3031_s8  ;;  %1852 = vrot.lane.b32.xlu0 %v2713_v18, %s3031_s8  ;;  %s2725_s8 = sshll.u32 %s3096_s28, 4  ;;  %s3034_s28 = smov [#allocation3]  }
 0x218   : > { %2811 = vmatmul.mubr.bf16.gmra.mrb[20].mxu0 %v1964_v25  ;;  %s4345_s19 = scalar_lea.hbm %s4394_s7, %s2725_s8  ;;  %s2963_s9 = sshll.u32 %s3034_s28, 4  ;;  %s2964_s9 = int_to_ptr.vmem [resolvable:$false] %s2963_s9 }
 0x219   : > { %v687_v26 = vpop.permute.xlu1 %686  ;;  %v685_v27 = vpop.permute.xlu0 %684  ;;  %s2965_s22 = scalar_lea.vmem %s2964_s9, 32  ;;  %p2966_p0 = scmp.lt.s32.totalorder %s4347_s15, %s2964_s9 }
 0x21a   : > { %756 = vst.msk [vmem:[#allocation2 + $0xd8] sm:$0xff] %vm728_vm3, %v687_v26  ;;  %755 = vst.msk [vmem:[#allocation2 + $0xd0] sm:$0xff] %vm728_vm3, %v685_v27  ;;  %p2967_p1 = scmp.lt.s32.totalorder %s2965_s22, %s2959_s21 }
 0x21c   : > { %p2968_p2 = por %p2967_p1, %p2966_p0 }
 0x21d   : > { %v877_v21 = vpop.permute.xlu1 %876  ;;  %v875_v22 = vpop.permute.xlu0 %874 }
 0x21e   : > { %948 = vst.msk [vmem:[#allocation2 + $0xc8] sm:$0xff] %vm922_vm4, %v877_v21  ;;  %947 = vst.msk [vmem:[#allocation2 + $0xc0] sm:$0xff] %vm922_vm4, %v875_v22  ;;  %p2969_p3 = pnand %p2968_p2, %p2962_p13 }
 0x221   : > { %v881_v30 = vpop.permute.xlu1 %880  ;;  %v879_v33 = vpop.permute.xlu0 %878 }
 0x222   : > { %950 = vst.msk [vmem:[#allocation2 + $0xd8] sm:$0xff] %vm922_vm4, %v881_v30  ;;  %949 = vst.msk [vmem:[#allocation2 + $0xd0] sm:$0xff] %vm922_vm4, %v879_v33 }
 0x225   : > { %v1070_v35 = vpop.permute.xlu1 %1069  ;;  %v1068_v36 = vpop.permute.xlu0 %1067 }
 0x226   : > { %1141 = vst.msk [vmem:[#allocation2 + $0xc8] sm:$0xff] %vm1115_vm5, %v1070_v35  ;;  %1140 = vst.msk [vmem:[#allocation2 + $0xc0] sm:$0xff] %vm1115_vm5, %v1068_v36 }
 0x229   : > { %v1074_v37 = vpop.permute.xlu1 %1073  ;;  %v1072_v38 = vpop.permute.xlu0 %1071 }
 0x22a   : > { %1143 = vst.msk [vmem:[#allocation2 + $0xd8] sm:$0xff] %vm1115_vm5, %v1074_v37  ;;  %1142 = vst.msk [vmem:[#allocation2 + $0xd0] sm:$0xff] %vm1115_vm5, %v1072_v38 }
 0x22b   : > { %v2800_v39 = vpop.f32.mrb[8].mxu0 }
 0x22c   : > { %v2106_v19 = vpop.f32.mrb[9].mxu0  ;;  %v2115_v45 = vadd.f32 %v2800_v39, %v3967_v34 }
 0x22d   : > { %v2107_v20 = vadd.f32 %v3967_v34, %v2106_v19  ;;  %v1263_v40 = vpop.permute.xlu1 %1262  ;;  %v1261_v43 = vpop.permute.xlu0 %1260 }
 0x22e   : > { %1334 = vst.msk [vmem:[#allocation2 + $0xc8] sm:$0xff] %vm1308_vm6, %v1263_v40  ;;  %1333 = vst.msk [vmem:[#allocation2 + $0xc0] sm:$0xff] %vm1308_vm6, %v1261_v43  ;;  %v2801_v44 = vpop.f32.mrb[10].mxu0  ;;  %v2211_v52 = vmax.f32 %v2115_v45, 0.0 }
 0x22f   : > { %v2209_v12 = vmax.f32 %v2107_v20, 0.0  ;;  %v2109_v8 = vpop.f32.mrb[11].mxu0  ;;  %v2118_v28 = vadd.f32 %v2801_v44, %v3967_v34 }
 0x230   : > { %v2110_v46 = vadd.f32 %v3967_v34, %v2109_v8 }
 0x231   : > { %v2240_v49 = vadd.f32 %v4118_v58, %v2209_v12  ;;  %v1267_v50 = vpop.permute.xlu1 %1266  ;;  %v1265_v51 = vpop.permute.xlu0 %1264  ;;  %v2212_v56 = vmax.f32 %v2118_v28, 0.0 }
 0x232   : > { %v2210_v29 = vmax.f32 %v2110_v46, 0.0  ;;  %1336 = vst.msk [vmem:[#allocation2 + $0xd8] sm:$0xff] %vm1308_vm6, %v1267_v50  ;;  %1335 = vst.msk [vmem:[#allocation2 + $0xd0] sm:$0xff] %vm1308_vm6, %v1265_v51 }
 0x234   : > { %v2241_v53 = vadd.f32 %v2240_v49, %v2210_v29 }
 0x235   : > { %v1457_v54 = vpop.permute.xlu1 %1456  ;;  %v1455_v55 = vpop.permute.xlu0 %1454 }
 0x236   : > { %v2242_v48 = vadd.f32 %v2241_v53, %v2211_v52  ;;  %1528 = vst.msk [vmem:[#allocation2 + $0xc8] sm:$0xff] %vm1502_vm7, %v1457_v54  ;;  %1527 = vst.msk [vmem:[#allocation2 + $0xc0] sm:$0xff] %vm1502_vm7, %v1455_v55 }
 0x238   : > { %v4183_v58 = vadd.f32 %v2242_v48, %v2212_v56 }
 0x239   : > { %v1461_v59 = vpop.permute.xlu1 %1460  ;;  %v1459_v60 = vpop.permute.xlu0 %1458 }
 0x23a   : > { %1530 = vst.msk [vmem:[#allocation2 + $0xd8] sm:$0xff] %vm1502_vm7, %v1461_v59  ;;  %1529 = vst.msk [vmem:[#allocation2 + $0xd0] sm:$0xff] %vm1502_vm7, %v1459_v60 }
 0x23d   : > { %v1650_v61 = vpop.permute.xlu1 %1649  ;;  %v1648_v62 = vpop.permute.xlu0 %1647 }
 0x23e   : > { %1721 = vst.msk [vmem:[#allocation2 + $0xc8] sm:$0xff] %vm1695_vm8, %v1650_v61  ;;  %1720 = vst.msk [vmem:[#allocation2 + $0xc0] sm:$0xff] %vm1695_vm8, %v1648_v62 }
 0x241   : > { %v1654_v63 = vpop.permute.xlu1 %1653  ;;  %v1652_v31 = vpop.permute.xlu0 %1651 }
 0x242   : > { %1723 = vst.msk [vmem:[#allocation2 + $0xd8] sm:$0xff] %vm1695_vm8, %v1654_v63  ;;  %1722 = vst.msk [vmem:[#allocation2 + $0xd0] sm:$0xff] %vm1695_vm8, %v1652_v31 }
 0x245   : > { %v1843_v32 = vpop.permute.xlu1 %1842  ;;  %v1841_v1 = vpop.permute.xlu0 %1840 }
 0x246   : > { %1914 = vst.msk [vmem:[#allocation2 + $0xc8] sm:$0xff] %vm1888_vm9, %v1843_v32  ;;  %1913 = vst.msk [vmem:[#allocation2 + $0xc0] sm:$0xff] %vm1888_vm9, %v1841_v1 }
 0x249   : > { %v498_v2 = vpop.permute.xlu1 %497  ;;  %v496_v3 = vpop.permute.xlu0 %495 }
 0x24a   : > { %565 = vst.msk [vmem:[#allocation2 + $0xe8] sm:$0xff] %vm535_vm2, %v498_v2  ;;  %564 = vst.msk [vmem:[#allocation2 + $0xe0] sm:$0xff] %vm535_vm2, %v496_v3 }
 0x24d   : > { %v1847_v57 = vpop.permute.xlu1 %1846  ;;  %v1845_v47 = vpop.permute.xlu0 %1844  ;;  %v1945_v4 = vld [vmem:[#allocation2 + $0xc0] sm:$0xff]  ;;  %v1946_v5 = vld [vmem:[#allocation2 + $0xc8] sm:$0xff] }
 0x24e   : > { %1916 = vst.msk [vmem:[#allocation2 + $0xd8] sm:$0xff] %vm1888_vm9, %v1847_v57  ;;  %1915 = vst.msk [vmem:[#allocation2 + $0xd0] sm:$0xff] %vm1888_vm9, %v1845_v47  ;;  %v1965_v6 = vpack.c.bf16 %v1946_v5, %v1945_v4 }
 0x250   : > { %2814 = vmatprep.mubr.bf16.mxu0 %v1965_v6 }
 0x251   : > { %v502_v7 = vpop.permute.xlu1 %501  ;;  %v500_v10 = vpop.permute.xlu0 %499 }
 0x252   : > { %567 = vst.msk [vmem:[#allocation2 + $0xf8] sm:$0xff] %vm535_vm2, %v502_v7  ;;  %566 = vst.msk [vmem:[#allocation2 + $0xf0] sm:$0xff] %vm535_vm2, %v500_v10 }
 0x255   : > { %v691_v11 = vpop.permute.xlu1 %690  ;;  %v689_v9 = vpop.permute.xlu0 %688  ;;  %v1947_v13 = vld [vmem:[#allocation2 + $0xd0] sm:$0xff]  ;;  %v1948_v14 = vld [vmem:[#allocation2 + $0xd8] sm:$0xff] }
 0x256   : > { %758 = vst.msk [vmem:[#allocation2 + $0xe8] sm:$0xff] %vm728_vm3, %v691_v11  ;;  %757 = vst.msk [vmem:[#allocation2 + $0xe0] sm:$0xff] %vm728_vm3, %v689_v9  ;;  %v1966_v15 = vpack.c.bf16 %v1948_v14, %v1947_v13 }
 0x258   : > { %2815 = vmatmul.mubr.bf16.gmra.mrb[24].mxu0 %v1966_v15 }
 0x259   : > { %v695_v16 = vpop.permute.xlu1 %694  ;;  %v693_v17 = vpop.permute.xlu0 %692 }
 0x25a   : > { %760 = vst.msk [vmem:[#allocation2 + $0xf8] sm:$0xff] %vm728_vm3, %v695_v16  ;;  %759 = vst.msk [vmem:[#allocation2 + $0xf0] sm:$0xff] %vm728_vm3, %v693_v17  ;;  %v2272_v17 = vld [vmem:[%s4390_s3] sm:$0xff] }
 0x25d   : > { %v885_v18 = vpop.permute.xlu1 %884  ;;  %v883_v41 = vpop.permute.xlu0 %882 }
 0x25e   : > { %952 = vst.msk [vmem:[#allocation2 + $0xe8] sm:$0xff] %vm922_vm4, %v885_v18  ;;  %951 = vst.msk [vmem:[#allocation2 + $0xe0] sm:$0xff] %vm922_vm4, %v883_v41  ;;  %v2273_v18 = vld [vmem:[%s4390_s3 + $0x8] sm:$0xff]  ;;  %v3032_v41 = vmov 0.0|0.0  }
 0x25f   : > { %2868 = vmatprep.subr.bf16.mxu1 %v3032_v41 }
 0x261   : > { %v889_v42 = vpop.permute.xlu1 %888  ;;  %v887_v23 = vpop.permute.xlu0 %886 }
 0x262   : > { %954 = vst.msk [vmem:[#allocation2 + $0xf8] sm:$0xff] %vm922_vm4, %v889_v42  ;;  %953 = vst.msk [vmem:[#allocation2 + $0xf0] sm:$0xff] %vm922_vm4, %v887_v23  ;;  %v2869_v42 = vpack.c.bf16 %v2273_v18, %v2272_v17 }
 0x264   : > { %2870 = vmatpush3.bf16.msra.mxu1 %v2869_v42 }
 0x265   : > { %v1078_v24 = vpop.permute.xlu1 %1077  ;;  %v1076_v25 = vpop.permute.xlu0 %1075  ;;  %2871 = vmatprep.subr.bf16.mxu1 %v3032_v41 }
 0x266   : > { %1145 = vst.msk [vmem:[#allocation2 + $0xe8] sm:$0xff] %vm1115_vm5, %v1078_v24  ;;  %1144 = vst.msk [vmem:[#allocation2 + $0xe0] sm:$0xff] %vm1115_vm5, %v1076_v25  ;;  %v2274_v24 = vld [vmem:[%s4390_s3 + $0x10] sm:$0xff]  ;;  %v2275_v25 = vld [vmem:[%s4390_s3 + $0x18] sm:$0xff] }
 0x269   : > { %v1082_v26 = vpop.permute.xlu1 %1081  ;;  %v1080_v27 = vpop.permute.xlu0 %1079 }
 0x26a   : > { %1147 = vst.msk [vmem:[#allocation2 + $0xf8] sm:$0xff] %vm1115_vm5, %v1082_v26  ;;  %1146 = vst.msk [vmem:[#allocation2 + $0xf0] sm:$0xff] %vm1115_vm5, %v1080_v27  ;;  %v2872_v26 = vpack.c.bf16 %v2275_v25, %v2274_v24  ;;  %v2276_v27 = vld [vmem:[%s4390_s3 + $0x20] sm:$0xff] }
 0x26b   : > { %v2804_v21 = vpop.f32.mrb[12].mxu0 }
 0x26c   : > { %v2122_v22 = vpop.f32.mrb[13].mxu0  ;;  %v2131_v39 = vadd.f32 %v2804_v21, %v3967_v34  ;;  %2873 = vmatpush3.bf16.msra.mxu1 %v2872_v26  ;;  %v2277_v21 = vld [vmem:[%s4390_s3 + $0x28] sm:$0xff] }
 0x26d   : > { %v2123_v30 = vadd.f32 %v3967_v34, %v2122_v22  ;;  %v1271_v33 = vpop.permute.xlu1 %1270  ;;  %v1269_v35 = vpop.permute.xlu0 %1268  ;;  %2874 = vmatprep.subr.bf16.mxu1 %v3032_v41 }
 0x26e   : > { %1338 = vst.msk [vmem:[#allocation2 + $0xe8] sm:$0xff] %vm1308_vm6, %v1271_v33  ;;  %1337 = vst.msk [vmem:[#allocation2 + $0xe0] sm:$0xff] %vm1308_vm6, %v1269_v35  ;;  %v2805_v36 = vpop.f32.mrb[14].mxu0  ;;  %v2215_v8 = vmax.f32 %v2131_v39, 0.0  ;;  %v2279_v39 = vld [vmem:[%s4390_s3 + $0x38] sm:$0xff] }
 0x26f   : > { %v2213_v37 = vmax.f32 %v2123_v30, 0.0  ;;  %v2125_v38 = vpop.f32.mrb[15].mxu0  ;;  %v2134_v44 = vadd.f32 %v2805_v36, %v3967_v34  ;;  %v2875_v30 = vpack.c.bf16 %v2277_v21, %v2276_v27 }
 0x270   : > { %v2126_v19 = vadd.f32 %v3967_v34, %v2125_v38  ;;  %v2278_v38 = vld [vmem:[%s4390_s3 + $0x30] sm:$0xff] }
 0x271   : > { %v2244_v20 = vadd.f32 %v4183_v58, %v2213_v37  ;;  %v1275_v40 = vpop.permute.xlu1 %1274  ;;  %v1273_v43 = vpop.permute.xlu0 %1272  ;;  %v2216_v50 = vmax.f32 %v2134_v44, 0.0  ;;  %2876 = vmatpush3.bf16.msra.mxu1 %v2875_v30 }
 0x272   : > { %v2214_v12 = vmax.f32 %v2126_v19, 0.0  ;;  %1340 = vst.msk [vmem:[#allocation2 + $0xf8] sm:$0xff] %vm1308_vm6, %v1275_v40  ;;  %1339 = vst.msk [vmem:[#allocation2 + $0xf0] sm:$0xff] %vm1308_vm6, %v1273_v43  ;;  %2877 = vmatprep.subr.bf16.mxu1 %v3032_v41  ;;  %v2878_v43 = vpack.c.bf16 %v2279_v39, %v2278_v38 }
 0x274   : > { %v2245_v45 = vadd.f32 %v2244_v20, %v2214_v12 }
 0x275   : > { %v1465_v46 = vpop.permute.xlu1 %1464  ;;  %v1463_v49 = vpop.permute.xlu0 %1462  ;;  %2879 = vmatpush3.bf16.msra.mxu1 %v2878_v43 }
 0x276   : > { %v2246_v51 = vadd.f32 %v2245_v45, %v2215_v8  ;;  %1532 = vst.msk [vmem:[#allocation2 + $0xe8] sm:$0xff] %vm1502_vm7, %v1465_v46  ;;  %1531 = vst.msk [vmem:[#allocation2 + $0xe0] sm:$0xff] %vm1502_vm7, %v1463_v49  ;;  %2880 = vmatprep.subr.bf16.mxu1 %v3032_v41  ;;  %v2280_v45 = vld [vmem:[%s4390_s3 + $0x40] sm:$0xff]  ;;  %v2281_v46 = vld [vmem:[%s4390_s3 + $0x48] sm:$0xff] }
 0x278   : > { %v2247_v28 = vadd.f32 %v2246_v51, %v2216_v50  ;;  %v2881_v51 = vpack.c.bf16 %v2281_v46, %v2280_v45 }
 0x279   : > { %v1469_v29 = vpop.permute.xlu1 %1468  ;;  %v1467_v52 = vpop.permute.xlu0 %1466 }
 0x27a   : > { %1534 = vst.msk [vmem:[#allocation2 + $0xf8] sm:$0xff] %vm1502_vm7, %v1469_v29  ;;  %1533 = vst.msk [vmem:[#allocation2 + $0xf0] sm:$0xff] %vm1502_vm7, %v1467_v52  ;;  %2882 = vmatpush3.bf16.msra.mxu1 %v2881_v51  ;;  %v2282_v52 = vld [vmem:[%s4390_s3 + $0x50] sm:$0xff] }
 0x27b   : > { %2883 = vmatprep.subr.bf16.mxu1 %v3032_v41 }
 0x27d   : > { %v1658_v53 = vpop.permute.xlu1 %1657  ;;  %v1656_v54 = vpop.permute.xlu0 %1655 }
 0x27e   : > { %1725 = vst.msk [vmem:[#allocation2 + $0xe8] sm:$0xff] %vm1695_vm8, %v1658_v53  ;;  %1724 = vst.msk [vmem:[#allocation2 + $0xe0] sm:$0xff] %vm1695_vm8, %v1656_v54  ;;  %v2283_v53 = vld [vmem:[%s4390_s3 + $0x58] sm:$0xff] }
 0x27f   : > { %v2884_v54 = vpack.c.bf16 %v2283_v53, %v2282_v52  ;;  %v2365_v52 = vld [vmem:[%s4391_s4 + $0x1] sm:$0x1] }
 0x281   : > { %v1662_v55 = vpop.permute.xlu1 %1661  ;;  %v1660_v56 = vpop.permute.xlu0 %1659  ;;  %2885 = vmatpush3.bf16.msra.mxu1 %v2884_v54  ;;  %v2367_v54 = vld [vmem:[%s4391_s4 + $0x2] sm:$0x1] }
 0x282   : > { %1727 = vst.msk [vmem:[#allocation2 + $0xf8] sm:$0xff] %vm1695_vm8, %v1662_v55  ;;  %1726 = vst.msk [vmem:[#allocation2 + $0xf0] sm:$0xff] %vm1695_vm8, %v1660_v56  ;;  %v2284_v55 = vld [vmem:[%s4390_s3 + $0x60] sm:$0xff]  ;;  %v2285_v56 = vld [vmem:[%s4390_s3 + $0x68] sm:$0xff]  ;;  %2886 = vmatprep.subr.bf16.mxu1 %v3032_v41 }
 0x285   : > { %v1851_v48 = vpop.permute.xlu1 %1850  ;;  %v1849_v58 = vpop.permute.xlu0 %1848 }
 0x286   : > { %1918 = vst.msk [vmem:[#allocation2 + $0xe8] sm:$0xff] %vm1888_vm9, %v1851_v48  ;;  %1917 = vst.msk [vmem:[#allocation2 + $0xe0] sm:$0xff] %vm1888_vm9, %v1849_v58  ;;  %v2887_v58 = vpack.c.bf16 %v2285_v56, %v2284_v55 }
 0x288   : > { %2888 = vmatpush3.bf16.msra.mxu1 %v2887_v58  ;;  %v2374_v58 = vld [vmem:[%s4393_s6] sm:$0x1] }
 0x289   : > { %v1855_v59 = vpop.permute.xlu1 %1854  ;;  %v1853_v60 = vpop.permute.xlu0 %1852  ;;  %2889 = vmatprep.subr.bf16.mxu1 %v3032_v41 }
 0x28a   : > { %1920 = vst.msk [vmem:[#allocation2 + $0xf8] sm:$0xff] %vm1888_vm9, %v1855_v59  ;;  %1919 = vst.msk [vmem:[#allocation2 + $0xf0] sm:$0xff] %vm1888_vm9, %v1853_v60  ;;  %v2286_v59 = vld [vmem:[%s4390_s3 + $0x70] sm:$0xff]  ;;  %v2287_v60 = vld [vmem:[%s4390_s3 + $0x78] sm:$0xff] }
 0x28d   : > { %v1949_v61 = vld [vmem:[#allocation2 + $0xe0] sm:$0xff]  ;;  %v1950_v62 = vld [vmem:[#allocation2 + $0xe8] sm:$0xff] }
 0x28e   : > { %v1967_v63 = vpack.c.bf16 %v1950_v62, %v1949_v61  ;;  %v2890_v61 = vpack.c.bf16 %v2287_v60, %v2286_v59 }
 0x290   : > { %2818 = vmatprep.mubr.bf16.mxu0 %v1967_v63  ;;  %2891 = vmatpush3.bf16.msra.mxu1 %v2890_v61 }
 0x291   : > { %v1951_v31 = vld [vmem:[#allocation2 + $0xf0] sm:$0xff]  ;;  %v1952_v32 = vld [vmem:[#allocation2 + $0xf8] sm:$0xff]  ;;  %2892 = vmatprep.subr.bf16.mxu1 %v3032_v41 }
 0x292   : > { %v1968_v1 = vpack.c.bf16 %v1952_v32, %v1951_v31 }
 0x294   : > { %2819 = vmatmul.mubr.bf16.gmra.mrb[28].mxu0 %v1968_v1 }
 0x2ab   : > { %v2808_v2 = vpop.f32.mrb[16].mxu0 }
 0x2ac   : > { %v2138_v3 = vpop.f32.mrb[17].mxu0  ;;  %v2147_v5 = vadd.f32 %v2808_v2, %v3967_v34 }
 0x2ad   : > { %v2139_v57 = vadd.f32 %v3967_v34, %v2138_v3  ;;  %v2809_v47 = vpop.f32.mrb[18].mxu0 }
 0x2ae   : > { %v2141_v4 = vpop.f32.mrb[19].mxu0  ;;  %v2150_v11 = vadd.f32 %v2809_v47, %v3967_v34  ;;  %v2219_v13 = vmax.f32 %v2147_v5, 0.0 }
 0x2af   : > { %v2217_v6 = vmax.f32 %v2139_v57, 0.0  ;;  %v2142_v7 = vadd.f32 %v3967_v34, %v2141_v4 }
 0x2b0   : > { %v2220_v15 = vmax.f32 %v2150_v11, 0.0 }
 0x2b1   : > { %v2248_v10 = vadd.f32 %v2247_v28, %v2217_v6  ;;  %v2218_v9 = vmax.f32 %v2142_v7, 0.0 }
 0x2b3   : > { %v2249_v14 = vadd.f32 %v2248_v10, %v2218_v9 }
 0x2b5   : > { %v2250_v16 = vadd.f32 %v2249_v14, %v2219_v13 }
 0x2b7   : > { %v2251_v23 = vadd.f32 %v2250_v16, %v2220_v15 }
 0x2eb   : > { %v2812_v22 = vpop.f32.mrb[20].mxu0 }
 0x2ec   : > { %v2154_v33 = vpop.f32.mrb[21].mxu0  ;;  %v2163_v19 = vadd.f32 %v2812_v22, %v3967_v34 }
 0x2ed   : > { %v2155_v35 = vadd.f32 %v3967_v34, %v2154_v33  ;;  %v2813_v36 = vpop.f32.mrb[22].mxu0 }
 0x2ee   : > { %v2157_v37 = vpop.f32.mrb[23].mxu0  ;;  %v2166_v12 = vadd.f32 %v2813_v36, %v3967_v34  ;;  %v2223_v49 = vmax.f32 %v2163_v19, 0.0 }
 0x2ef   : > { %v2221_v20 = vmax.f32 %v2155_v35, 0.0  ;;  %v2158_v40 = vadd.f32 %v3967_v34, %v2157_v37 }
 0x2f0   : > { %v2224_v28 = vmax.f32 %v2166_v12, 0.0 }
 0x2f1   : > { %v2252_v44 = vadd.f32 %v2251_v23, %v2221_v20  ;;  %v2222_v8 = vmax.f32 %v2158_v40, 0.0  ;;  %v2371_v40 = vld [vmem:[%s4392_s5 + $0x8] sm:$0xff] }
 0x2f3   : > { %v2253_v50 = vadd.f32 %v2252_v44, %v2222_v8  ;;  %v2372_v44 = vld [vmem:[%s4392_s5 + $0x10] sm:$0xff]  ;;  %v2361_v8 = vld [vmem:[%s4391_s4 + $0x4] sm:$0x1] }
 0x2f4   : > { %v2362_v45 = vadd.f32 1e-05, %v2361_v8 }
 0x2f5   : > { %v2254_v29 = vadd.f32 %v2253_v50, %v2223_v49  ;;  %v2359_v49 = vld [vmem:[%s4391_s4 + $0x3] sm:$0x1] }
 0x2f6   : > { %2957 = vrsqrt.f32 %v2362_v45 }
 0x2f7   : > { %v2255_v48 = vadd.f32 %v2254_v29, %v2224_v28 }
 0x300   : > { %v2958_v28 = vpop.eup %2957 }
 0x32b   : > { %v2816_v62 = vpop.f32.mrb[24].mxu0 }
 0x32c   : > { %v2170_v63 = vpop.f32.mrb[25].mxu0  ;;  %v2179_v2 = vadd.f32 %v2816_v62, %v3967_v34 }
 0x32d   : > { %v2171_v31 = vadd.f32 %v3967_v34, %v2170_v63  ;;  %v2817_v32 = vpop.f32.mrb[26].mxu0 }
 0x32e   : > { %v2173_v1 = vpop.f32.mrb[27].mxu0  ;;  %v2182_v4 = vadd.f32 %v2817_v32, %v3967_v34  ;;  %v2227_v6 = vmax.f32 %v2179_v2, 0.0 }
 0x32f   : > { %v2225_v3 = vmax.f32 %v2171_v31, 0.0  ;;  %v2174_v57 = vadd.f32 %v3967_v34, %v2173_v1 }
 0x330   : > { %v2228_v10 = vmax.f32 %v2182_v4, 0.0 }
 0x331   : > { %v2256_v47 = vadd.f32 %v2255_v48, %v2225_v3  ;;  %v2226_v5 = vmax.f32 %v2174_v57, 0.0 }
 0x333   : > { %v2257_v7 = vadd.f32 %v2256_v47, %v2226_v5 }
 0x335   : > { %v2258_v11 = vadd.f32 %v2257_v7, %v2227_v6 }
 0x337   : > { %v2259_v9 = vadd.f32 %v2258_v11, %v2228_v10 }
 0x367   : > { %v2820_v13 = vpop.f32.mrb[28].mxu0 }
 0x368   : > { %v2186_v14 = vpop.f32.mrb[29].mxu0  ;;  %v2195_v18 = vadd.f32 %v2820_v13, %v3967_v34 }
 0x369   : > { %v2187_v15 = vadd.f32 %v3967_v34, %v2186_v14  ;;  %v2821_v16 = vpop.f32.mrb[30].mxu0 }
 0x36a   : > { %v2189_v17 = vpop.f32.mrb[31].mxu0  ;;  %v2198_v25 = vadd.f32 %v2821_v16, %v3967_v34  ;;  %v2231_v27 = vmax.f32 %v2195_v18, 0.0 }
 0x36b   : > { %v2229_v42 = vmax.f32 %v2187_v15, 0.0  ;;  %v2190_v23 = vadd.f32 %v3967_v34, %v2189_v17  ;;  %v2370_v34 = vld [vmem:[%s4392_s5] sm:$0xff] }
 0x36c   : > { %v2232_v22 = vmax.f32 %v2198_v25, 0.0  ;;  %v2893_v43 = vpack.c.bf16 %v2371_v40, %v2370_v34 }
 0x36d   : > { %v2260_v24 = vadd.f32 %v2259_v9, %v2229_v42  ;;  %v2230_v26 = vmax.f32 %v2190_v23, 0.0 }
 0x36f   : > { %v2261_v21 = vadd.f32 %v2260_v24, %v2230_v26 }
 0x371   : > { %v2262_v30 = vadd.f32 %v2261_v21, %v2231_v27 }
 0x373   : > { %v2263_v33 = vadd.f32 %v2262_v30, %v2232_v22 }
 0x375   : > { %v2264_v35 = vrot.slane %v2263_v33, 4 }
 0x377   : > { %v2265_v36 = vadd.f32 %v2264_v35, %v2263_v33 }
 0x379   : > { %v2266_v37 = vrot.slane %v2265_v36, 2 }
 0x37b   : > { %v2267_v38 = vadd.f32 %v2266_v37, %v2265_v36 }
 0x37d   : > { %v2268_v39 = vrot.slane %v2267_v38, 1 }
 0x37f   : > { %v2269_v19 = vadd.f32 %v2268_v39, %v2267_v38 }
 0x381   : > { %v2271_v20 = vmul.f32 0.00390625, %v2269_v19 }
 0x383   : > { %2855 = vmatmul.mubr.f32.vlgmr.msra.gmra.mrb[0].mxu1 %v2271_v20 }
 0x384   : > { %2865 = vmatprep.mubr.msk.f32.mxu1 %vm3033_vm10, %v3023_v0  ;;  %2894 = vmatpush3.bf16.msra.mxu1 %v2893_v43  ;;  %v2373_v0 = vld [vmem:[%s4392_s5 + $0x18] sm:$0xff] }
 0x385   : > { %2895 = vmatprep.subr.bf16.mxu1 %v3032_v41  ;;  %v2896_v12 = vpack.c.bf16 %v2373_v0, %v2372_v44  ;;  %v2288_v41 = vld [vmem:[%s4391_s4] sm:$0x1] }
 0x388   : > { %2897 = vmatpush3.bf16.msra.mxu1 %v2896_v12 }
 0x456   : > { %v2355_v46 = vpop.f32.mrb[0].mxu1 }
 0x457   : > { %v2356_v50 = vadd.f32 %v2355_v46, %v2288_v41  ;;  %v2856_v51 = vpop.f32.mrb[1].mxu1 }
 0x459   : > { %v2360_v29 = vsub.f32 %v2356_v50, %v2359_v49 }
 0x45b   : > { %v2364_v53 = vmul.f32 %v2958_v28, %v2360_v29 }
 0x45d   : > { %v2366_v55 = vmul.f32 %v2365_v52, %v2364_v53 }
 0x45f   : > { %v2368_v56 = vadd.f32 %v2367_v54, %v2366_v55 }
 0x461   : > { %v2369_v48 = vmax.f32 %v2368_v56, 0.0 }
 0x463   : > { %2866 = vmatmul.mubr.msk.f32.vlgmr.msra.gmra.mrb[2].mxu1 %vm2375_vm11, %v2369_v48 }
 0x536   : > { %v2445_v59 = vpop.f32.mrb[2].mxu1 }
 0x537   : > { %v2446_v60 = vadd.f32 %v2445_v59, %v2374_v58  ;;  %v2867_v61 = vpop.f32.mrb[3].mxu1 }
 0x539   : > { %2449 = vst [vmem:[%s270_s13] sm:$0x1] %v2446_v60 }
 0x53a   : > { %2972 = shalt.err (!%p2969_p3)
}
 0x53b   : > { %s2973_s14 = scalar_lea.hbm %s4345_s19, 16  ;;  %s2977_s29 = scalar_lea.hbm %s4394_s7, 32 }
 0x53c   : > { %p2974_p4 = scmp.ne.s32.totalorder %s4345_s19, %s2973_s14  ;;  %p2978_p9 = scmp.lt.u32.totalorder %s4345_s19, %s4394_s7 }
 0x53d   : > { %p2979_p10 = scmp.lt.u32.totalorder %s2977_s29, %s2973_s14  ;;  %p2981_p12 = scmp.lt.u32.totalorder %s2973_s14, %s4345_s19 }
 0x53e   : > { %p2975_p7 = pnand %p2974_p4, %p3113_p5 }
 0x53f   : > { %p2980_p11 = por %p2979_p10, %p2978_p9 }
 0x540   : > { %p2976_p8 = pneg %p2975_p7 }
 0x541   : > { %p2982_p13 = por %p2981_p12, %p2980_p11 }
 0x543   : > { %p2983_p0 = pnand %p2982_p13, %p2976_p8 }
 0x545   : > { %2986 = shalt.err (!%p2983_p0)
}
 0x546   : > { %2899 = dma.vmem_to_hbm [thread:$0]  (%p3113_p5), %s4347_s15, 16, %s4345_s19, %s2451_s20  }
 0x547 PF: > { %p2905_p1 = scmp.ge.s32.totalorder %s3021_s27, 2  ;;  %s2475_s17 = sand.u32 1, %s3009_s24  }
 0x548   : > { %s2476_s18 = scalar_lea.sflag [#allocation4], %s2475_s17 }
 0x549   : > { %p2902_p2 = pnand %p2905_p1, %p3117_p6 }
 0x54b   : > { %3004 = dma.done.wait (!%p2902_p2), %s2476_s18, 16  }
 0x54c   : > { %3006 = vsyncadd (!%p2902_p2), %s2476_s18, 4294967280  ;;  %p17_p3 = scmp.ge.s32.totalorder %s3100_s30, 4   ;;  %s4397_s24 = smov %s3013_s25 }
 0x54d   : > { %s4398_s25 = smov %s3017_s26  ;;  %s4399_s26 = smov %s3111_s10 }
 0x54e   : > { %s4400_s27 = smov %s3100_s30  ;;  %19 = sbr.rel (!%p17_p3) target bundleno = 3 (0x3), region = 85 }
 0x555   :  { %2480 = vsyncpa [#allocation4], 1 }
 0x556   :  { %2482 = vsyncpa [#allocation4 + $0x1], 1 }

</bundles_post_ra>
